<compile_context>
chip_gen: v6e
topology: v6e:2x2x1
jax: 0.10.0
libtpu: 0.0.40
codegen_flags: <defaults>
</compile_context>

<pallas_src>
import functools

import numpy as np
import jax
import jax.numpy as jnp
from jax.experimental import pallas as pl
from jax.experimental.pallas import tpu as pltpu


_VMEM_LIMIT_BYTES = 48 * 1024 * 1024   # fits v7x's 64 MiB physical VMEM
_VMEM_BUDGET_BYTES = 40 * 1024 * 1024  # working-set target for tile sizing


def _round_up(x, m):
    return (x + m - 1) // m * m


# ----------------------------------------------------------------------------
# Pallas kernels
# ----------------------------------------------------------------------------
def _matmul_shift_kernel(x_ref, w_ref, b_ref, o_ref, *, relu, compute_dtype):
    # x: (TR, Cin)  w (BN-scale folded): (Cin, F)  b: (1, F)  o: (TR, F)
    x = x_ref[...].astype(compute_dtype)           # in-kernel cast (vreg-level)
    acc = jnp.dot(x, w_ref[...], preferred_element_type=jnp.float32)
    y = acc + b_ref[...]
    if relu:
        y = jnp.maximum(y, 0.0)
    o_ref[...] = y.astype(o_ref.dtype)


def _matmul_shift_res_kernel(x_ref, w_ref, b_ref, r_ref, o_ref, *, relu,
                             compute_dtype):
    # Same as above + fused residual add (residual streamed in its own dtype,
    # promoted to f32 for the add).
    x = x_ref[...].astype(compute_dtype)
    acc = jnp.dot(x, w_ref[...], preferred_element_type=jnp.float32)
    y = acc + b_ref[...] + r_ref[...].astype(jnp.float32)
    if relu:
        y = jnp.maximum(y, 0.0)
    o_ref[...] = y.astype(o_ref.dtype)


def _conv3x3_bn_relu_kernel(*refs, TH, W_out, Cin, F, stride, use_im2col,
                            compute_dtype):
    """Fused 3x3 conv (BN scale folded into weights) + shift + ReLU.

    stride == 1: refs = (band, halo0, halo1, w, b, o)
    stride == 2: refs = (band_e, halo0_e, halo1_e, band_o, halo0_o, halo1_o, w, b, o)
        where *_e / *_o are even / odd column phases of the padded input.
    """
    w_ref, b_ref, o_ref = refs[-3], refs[-2], refs[-1]
    x_refs = refs[:-3]

    def band(three):
        xb, xh0, xh1 = three
        # (B, Wb, Cin) ++ (1, Wb, Cin) ++ (1, Wb, Cin) along the outer (row) dim.
        return jnp.concatenate([xb[0], xh0[0], xh1[0]],
                               axis=0).astype(compute_dtype)

    if stride == 1:
        bands = [band(x_refs)]                      # [(TH+2, W+2, Cin)]
    else:
        bands = [band(x_refs[:3]), band(x_refs[3:])]  # even / odd column phases

    def rows_for(b, dy):
        if stride == 1:
            return b[dy:dy + TH]                    # (TH, Wb, Cin)
        blk = b[dy:dy + 2 * TH]                     # (2*TH, Wb, Cin)
        # Outer-dim-only reshape + index: picks rows dy, dy+2, ... (native
        # stride-2 on the row axis, no wasted compute).
        return blk.reshape(TH, 2, blk.shape[1], Cin)[:, 0]

    acc = jnp.zeros((TH * W_out, F), jnp.float32)
    for dy in range(3):
        if stride == 1:
            r = rows_for(bands[0], dy)
            cols = [r[:, 0:W_out], r[:, 1:W_out + 1], r[:, 2:W_out + 2]]
        else:
            re_ = rows_for(bands[0], dy)            # even columns
            ro_ = rows_for(bands[1], dy)            # odd columns
            cols = [re_[:, 0:W_out], ro_[:, 0:W_out], re_[:, 1:W_out + 1]]
        if use_im2col:
            # One K = 3*Cin matmul per kernel row (per-dy split keeps the
            # in-VMEM patch temporary ~3x smaller than a 9-way concat).
            patches = jnp.concatenate(cols, axis=-1).reshape(TH * W_out, 3 * Cin)
            acc = acc + jnp.dot(patches, w_ref[dy],
                                preferred_element_type=jnp.float32)
        else:
            # Lane-unaligned Cin: 9 small dots, f32 accumulate.
            # TODO(synk): on v5e, pairs of taps could be packed along K to fill
            #             the 128-deep MXU when Cin == 64.
            for dx in range(3):
                acc = acc + jnp.dot(cols[dx].reshape(TH * W_out, Cin),
                                    w_ref[dy, dx],
                                    preferred_element_type=jnp.float32)
    y = jnp.maximum(acc + b_ref[...], 0.0)
    o_ref[0] = y.reshape(TH, W_out, F).astype(o_ref.dtype)


# ----------------------------------------------------------------------------
# Wrappers
# ----------------------------------------------------------------------------
def conv1x1_bn_act(x_nhwc, w, shift, *, residual=None, relu=True,
                   compute_dtype=jnp.float32, out_dtype=None, block_rows=None):
    """Fused 1x1 conv (BN scale folded into w) + shift + optional residual + ReLU."""
    N, H, W, Cin = x_nhwc.shape
    F = w.shape[1]
    out_dtype = compute_dtype if out_dtype is None else out_dtype
    R = N * H * W

    in_bytes = jnp.dtype(x_nhwc.dtype).itemsize
    cd_bytes = jnp.dtype(compute_dtype).itemsize
    out_bytes = jnp.dtype(out_dtype).itemsize
    res_bytes = jnp.dtype(residual.dtype).itemsize if residual is not None else 0

    if block_rows is None:
        block_rows = 2048 if cd_bytes <= 2 else 1024
    TR = min(block_rows, _round_up(R, 8))
    # Shrink the row tile until the double-buffered working set fits the budget.
    while TR > 8:
        need = (2 * TR * Cin * in_bytes            # x (double buffered)
                + 2 * TR * F * out_bytes           # output
                + 2 * TR * F * res_bytes           # residual (if any)
                + TR * F * 4                       # f32 accumulator
                + 2 * Cin * F * cd_bytes           # weights
                + 16 * F)                          # shift
        if need <= _VMEM_BUDGET_BYTES:
            break
        TR = max(8, _round_up(TR // 2, 8))
    Rp = _round_up(R, TR)

    x2 = x_nhwc.reshape(R, Cin)                    # layout no-op; cast is in-kernel
    if Rp != R:
        x2 = jnp.pad(x2, ((0, Rp - R), (0, 0)))

    args = [x2, w.astype(compute_dtype), shift.reshape(1, F).astype(jnp.float32)]
    in_specs = [
        pl.BlockSpec((TR, Cin), lambda i: (i, 0)),
        pl.BlockSpec((Cin, F), lambda i: (0, 0)),
        pl.BlockSpec((1, F), lambda i: (0, 0)),
    ]
    if residual is not None:
        r2 = residual.reshape(R, F)
        if Rp != R:
            r2 = jnp.pad(r2, ((0, Rp - R), (0, 0)))
        args.append(r2)
        in_specs.append(pl.BlockSpec((TR, F), lambda i: (i, 0)))
        kern = functools.partial(_matmul_shift_res_kernel, relu=relu,
                                 compute_dtype=compute_dtype)
    else:
        kern = functools.partial(_matmul_shift_kernel, relu=relu,
                                 compute_dtype=compute_dtype)

    out = pl.pallas_call(
        kern,
        out_shape=jax.ShapeDtypeStruct((Rp, F), out_dtype),
        grid=(Rp // TR,),
        in_specs=in_specs,
        out_specs=pl.BlockSpec((TR, F), lambda i: (i, 0)),
        compiler_params=pltpu.CompilerParams(
            dimension_semantics=("parallel",),
            vmem_limit_bytes=_VMEM_LIMIT_BYTES),
    )(*args)
    if Rp != R:
        out = out[:R]
    return out.reshape(N, H, W, F)


def _pick_row_tile(H_out, W_out, bytes_per_out_row, fixed_bytes,
                   budget=_VMEM_BUDGET_BYTES, max_rows=2048):
    best = 1
    for t in range(1, H_out + 1):
        if H_out % t:
            continue
        if t * W_out > max_rows and t > 1:
            continue
        if fixed_bytes + t * bytes_per_out_row <= budget:
            best = t
    return best


def conv3x3_bn_relu(x_nhwc, w3, shift, *, stride=1, compute_dtype=jnp.float32,
                    out_dtype=None):
    """Fused 3x3 pad-1 conv (BN scale folded into w3) + shift + ReLU, stride 1 or 2."""
    N, H, W, Cin = x_nhwc.shape
    F = w3.shape[-1]
    out_dtype = compute_dtype if out_dtype is None else out_dtype

    if stride not in (1, 2) or (stride == 2 and (H % 2 or W % 2)):
        # TODO(synk): exotic strides / odd spatial sizes fall back to stride-1
        #             compute + XLA subsample (wasted FLOPs, correctness only).
        y = conv3x3_bn_relu(x_nhwc, w3, shift, stride=1,
                            compute_dtype=compute_dtype, out_dtype=out_dtype)
        return y[:, ::stride, ::stride, :]

    H_out, W_out = H // stride, W // stride
    use_im2col = (Cin % 128 == 0)
    cd_bytes = jnp.dtype(compute_dtype).itemsize
    out_bytes = jnp.dtype(out_dtype).itemsize

    # TODO(synk): halo zero-padding via jnp.pad is an extra XLA pass.
    xp = jnp.pad(x_nhwc, ((0, 0), (1, 1), (1, 1), (0, 0)))

    per_row = (2 * stride * (W + 2) * Cin * cd_bytes       # band rows (dbl buf)
               + 2 * W_out * F * out_bytes                 # output row (dbl buf)
               + W_out * (3 * Cin * cd_bytes + F * 4))     # patch temp + f32 acc
    fixed = 2 * 9 * Cin * F * cd_bytes + 4 * (W + 2) * Cin * cd_bytes + 64 * F
    TH = _pick_row_tile(H_out, W_out, per_row, fixed)
    nH = H_out // TH
    B = TH * stride                                        # input band rows / tile

    def _x_specs(Wb):
        # Band + two single-row halo views of the same padded array: halo tiling
        # with standard Blocked specs (per-tile VMEM stays small, DMA pipelines).
        return [
            pl.BlockSpec((1, B, Wb, Cin), lambda i: (i // nH, i % nH, 0, 0)),
            pl.BlockSpec((1, 1, Wb, Cin),
                         lambda i: (i // nH, (i % nH + 1) * B, 0, 0)),
            pl.BlockSpec((1, 1, Wb, Cin),
                         lambda i: (i // nH, (i % nH + 1) * B + 1, 0, 0)),
        ]

    if stride == 1:
        x_args = [xp, xp, xp]
        x_specs = _x_specs(W + 2)
    else:
        # Pre-split even/odd columns once (cheap XLA strided slice on the block's
        # smallest activation) so the kernel's stride-2 extraction uses only
        # contiguous slices -> native stride-2, no 4x wasted MXU work.
        xpe = xp[:, :, 0::2, :]
        xpo = xp[:, :, 1::2, :]
        x_args = [xpe, xpe, xpe, xpo, xpo, xpo]
        x_specs = _x_specs(W_out + 1) + _x_specs(W_out + 1)

    if use_im2col:
        w_arg = w3.reshape(3, 3 * Cin, F).astype(compute_dtype)
        w_spec = pl.BlockSpec((3, 3 * Cin, F), lambda i: (0, 0, 0))
    else:
        w_arg = w3.astype(compute_dtype)
        w_spec = pl.BlockSpec((3, 3, Cin, F), lambda i: (0, 0, 0, 0))

    kern = functools.partial(_conv3x3_bn_relu_kernel, TH=TH, W_out=W_out,
                             Cin=Cin, F=F, stride=stride, use_im2col=use_im2col,
                             compute_dtype=compute_dtype)
    return pl.pallas_call(
        kern,
        out_shape=jax.ShapeDtypeStruct((N, H_out, W_out, F), out_dtype),
        grid=(N * nH,),
        in_specs=x_specs + [w_spec, pl.BlockSpec((1, F), lambda i: (0, 0))],
        out_specs=pl.BlockSpec((1, TH, W_out, F),
                               lambda i: (i // nH, i % nH, 0, 0)),
        compiler_params=pltpu.CompilerParams(
            dimension_semantics=("parallel",),
            vmem_limit_bytes=_VMEM_LIMIT_BYTES),
    )(*x_args, w_arg, shift.reshape(1, F).astype(jnp.float32))


# ----------------------------------------------------------------------------
# Module glue (layout, BN folding, parameters, forward)
# ----------------------------------------------------------------------------
def _to_nhwc(x):
    return jnp.transpose(x, (0, 2, 3, 1))


def _to_nchw(x):
    return jnp.transpose(x, (0, 3, 1, 2))


def _w1x1(w_pt):   # (F, Cin, 1, 1) -> (Cin, F)
    return jnp.transpose(w_pt[:, :, 0, 0], (1, 0))


def _w3x3(w_pt):   # (F, Cin, 3, 3) -> (3, 3, Cin, F)
    return jnp.transpose(w_pt, (2, 3, 1, 0))


def _bn_fold(bn, eps=1e-5):
    # Inference-mode BatchNorm folded to per-channel scale/shift.
    scale = bn["gamma"] * jax.lax.rsqrt(bn["var"] + eps)
    shift = bn["beta"] - bn["mean"] * scale
    return scale, shift


def init_bottleneck_params(key, inplanes, planes, *, has_downsample=False):
    expansion = 4
    keys = iter(jax.random.split(key, 24))

    def conv_init(k, out_c, in_c, kh, kw):
        fan_in = in_c * kh * kw
        return jax.random.normal(k, (out_c, in_c, kh, kw), jnp.float32) / np.sqrt(fan_in)

    def bn_init(c):
        return {
            "gamma": 1.0 + 0.1 * jax.random.normal(next(keys), (c,), jnp.float32),
            "beta": 0.1 * jax.random.normal(next(keys), (c,), jnp.float32),
            "mean": 0.1 * jax.random.normal(next(keys), (c,), jnp.float32),
            "var": 1.0 + 0.2 * jax.random.uniform(next(keys), (c,), jnp.float32),
        }

    p = {
        "conv1_w": conv_init(next(keys), planes, inplanes, 1, 1),
        "conv2_w": conv_init(next(keys), planes, planes, 3, 3),
        "conv3_w": conv_init(next(keys), planes * expansion, planes, 1, 1),
    }
    p["bn1"] = bn_init(planes)
    p["bn2"] = bn_init(planes)
    p["bn3"] = bn_init(planes * expansion)
    if has_downsample:
        p["down_conv_w"] = conv_init(next(keys), planes * expansion, inplanes, 1, 1)
        p["down_bn"] = bn_init(planes * expansion)
    return p


def bottleneck_forward_nhwc(params, x, *, stride=1, compute_dtype=jnp.bfloat16):
    """NHWC Bottleneck: conv1x1-bn-relu, conv3x3(s)-bn-relu, conv1x1-bn (+res)-relu."""
    has_down = "down_conv_w" in params

    s1, b1 = _bn_fold(params["bn1"])
    w1 = _w1x1(params["conv1_w"]) * s1[None, :]            # BN scale folded into w
    out = conv1x1_bn_act(x, w1, b1, relu=True,
                         compute_dtype=compute_dtype, out_dtype=compute_dtype)

    s2, b2 = _bn_fold(params["bn2"])
    w2 = _w3x3(params["conv2_w"]) * s2[None, None, None, :]
    out = conv3x3_bn_relu(out, w2, b2, stride=stride,
                          compute_dtype=compute_dtype, out_dtype=compute_dtype)

    if has_down:
        sd, bd = _bn_fold(params["down_bn"])
        wd = _w1x1(params["down_conv_w"]) * sd[None, :]
        # TODO(synk): the stride-2 residual subsample is an XLA slice; it could be
        #             folded into the 1x1 conv's input indexing.
        xs = x[:, ::stride, ::stride, :] if stride > 1 else x
        residual = conv1x1_bn_act(xs, wd, bd, relu=False,
                                  compute_dtype=compute_dtype,
                                  out_dtype=jnp.float32)
    else:
        residual = x                      # streamed in input dtype, added in f32

    s3, b3 = _bn_fold(params["bn3"])
    w3 = _w1x1(params["conv3_w"]) * s3[None, :]
    out = conv1x1_bn_act(out, w3, b3, residual=residual, relu=True,
                         compute_dtype=compute_dtype, out_dtype=jnp.float32)
    return out


def bottleneck_forward(params, x_nchw, *, stride=1, compute_dtype=jnp.bfloat16):
    """NCHW-facing wrapper matching the PyTorch module interface."""
    x = _to_nhwc(x_nchw)
    out = bottleneck_forward_nhwc(params, x, stride=stride,
                                  compute_dtype=compute_dtype)
    return _to_nchw(out)


# ----------------------------------------------------------------------------
# Pure-JAX reference (lax.conv) for correctness cross-check
# ----------------------------------------------------------------------------
def bottleneck_ref(params, x, *, stride=1):
    def conv(inp, w, s=1, pad=0):
        return jax.lax.conv_general_dilated(
            inp, w, (s, s), ((pad, pad), (pad, pad)),
            dimension_numbers=("NCHW", "OIHW", "NCHW"))

    def bn(y, p):
        sc, sh = _bn_fold(p)
        return y * sc[None, :, None, None] + sh[None, :, None, None]

    out = jax.nn.relu(bn(conv(x, params["conv1_w"]), params["bn1"]))
    out = jax.nn.relu(bn(conv(out, params["conv2_w"], s=stride, pad=1), params["bn2"]))
    out = bn(conv(out, params["conv3_w"]), params["bn3"])
    if "down_conv_w" in params:
        res = bn(conv(x, params["down_conv_w"], s=stride), params["down_bn"])
    else:
        res = x
    return jax.nn.relu(out + res)


# ----------------------------------------------------------------------------
if __name__ == "__main__":
    key = jax.random.PRNGKey(0)
    kx1, kp1, kx2, kp2, kx3, kp3 = jax.random.split(key, 6)

    # Config A: identity residual (inplanes == 4*planes, stride=1), lane-aligned
    # channels -> exercises the halo-tiled per-dy im2col path.
    B, planes, H = 2, 128, 16
    inplanes = planes * 4
    x1 = jax.random.normal(kx1, (B, inplanes, H, H), jnp.float32)
    params1 = init_bottleneck_params(kp1, inplanes, planes, has_downsample=False)

    out_f32 = jax.block_until_ready(
        bottleneck_forward(params1, x1, stride=1, compute_dtype=jnp.float32))
    ref1 = jax.block_until_ready(bottleneck_ref(params1, x1, stride=1))
    assert out_f32.shape == ref1.shape, (out_f32.shape, ref1.shape)
    np.testing.assert_allclose(np.asarray(out_f32), np.asarray(ref1),
                               rtol=1e-2, atol=1e-2)

    # Same config with the default bf16 compute (f32 accumulate) -> loose tolerance.
    out_bf16 = jax.block_until_ready(bottleneck_forward(params1, x1, stride=1))
    np.testing.assert_allclose(np.asarray(out_bf16), np.asarray(ref1),
                               rtol=1e-1, atol=1e-1)

    # Config B: stride=2 + 1x1 downsample, small channels -> exercises the
    # non-lane-aligned 9-dot fallback with native stride-2 extraction.
    B2, inplanes2, planes2, H2 = 2, 64, 16, 16
    x2 = jax.random.normal(kx2, (B2, inplanes2, H2, H2), jnp.float32)
    params2 = init_bottleneck_params(kp2, inplanes2, planes2, has_downsample=True)

    out2 = jax.block_until_ready(
        bottleneck_forward(params2, x2, stride=2, compute_dtype=jnp.float32))
    ref2 = jax.block_until_ready(bottleneck_ref(params2, x2, stride=2))
    assert out2.shape == ref2.shape, (out2.shape, ref2.shape)
    np.testing.assert_allclose(np.asarray(out2), np.asarray(ref2),
                               rtol=1e-2, atol=1e-2)

    # Config C: stride=2 + downsample with lane-aligned channels -> exercises the
    # im2col path together with native stride-2 (the realistic ResNet case).
    B3, inplanes3, planes3, H3 = 1, 256, 128, 16
    x3 = jax.random.normal(kx3, (B3, inplanes3, H3, H3), jnp.float32)
    params3 = init_bottleneck_params(kp3, inplanes3, planes3, has_downsample=True)

    out3 = jax.block_until_ready(
        bottleneck_forward(params3, x3, stride=2, compute_dtype=jnp.float32))
    ref3 = jax.block_until_ready(bottleneck_ref(params3, x3, stride=2))
    assert out3.shape == ref3.shape, (out3.shape, ref3.shape)
    np.testing.assert_allclose(np.asarray(out3), np.asarray(ref3),
                               rtol=1e-2, atol=1e-2)

    print("KERNEL_OK")
</pallas_src>

<mosaic_0001>
module attributes {stable_mosaic.version = 11 : i64} {
  func.func @_matmul_shift_kernel(%arg0: i32, %arg1: memref<512x512xf32, #tpu.memory_space<vmem>>, %arg2: memref<512x128xf32, #tpu.memory_space<vmem>>, %arg3: memref<1x128xf32, #tpu.memory_space<vmem>>, %arg4: memref<512x128xf32, #tpu.memory_space<vmem>>) attributes {dimension_semantics = [#tpu.dimension_semantics<parallel>], iteration_bounds = array<i64: 1>, scalar_prefetch = 0 : i64, scratch_operands = 0 : i64, tpu.core_type = #tpu.core_type<tc>, window_params = [{transform_indices = @transform_0, window_bounds = array<i64: 512, 512>}, {pipeline_mode = #tpu.pipeline_mode<synchronous>, transform_indices = @transform_1, window_bounds = array<i64: 512, 128>}, {pipeline_mode = #tpu.pipeline_mode<synchronous>, transform_indices = @transform_2, window_bounds = array<i64: 1, 128>}, {transform_indices = @transform_3, window_bounds = array<i64: 512, 128>}]} {
    %c0 = arith.constant 0 : index
    %c0_0 = arith.constant 0 : index
    %0 = vector.load %arg1[%c0, %c0_0] : memref<512x512xf32, #tpu.memory_space<vmem>>, vector<512x512xf32>
    %c0_1 = arith.constant 0 : index
    %c0_2 = arith.constant 0 : index
    %1 = vector.load %arg2[%c0_1, %c0_2] : memref<512x128xf32, #tpu.memory_space<vmem>>, vector<512x128xf32>
    %cst = arith.constant dense<0.000000e+00> : vector<512x128xf32>
    %2 = tpu.matmul %0, %1, %cst {dimension_numbers = #tpu.dot_dimension_numbers<[1], [0], [0], [1], [0, 0, 1, 1], [], []>} : vector<512x512xf32>, vector<512x128xf32>, vector<512x128xf32> -> vector<512x128xf32>
    %c0_3 = arith.constant 0 : index
    %c0_4 = arith.constant 0 : index
    %3 = vector.load %arg3[%c0_3, %c0_4] : memref<1x128xf32, #tpu.memory_space<vmem>>, vector<1x128xf32>
    %4 = vector.broadcast %3 : vector<1x128xf32> to vector<512x128xf32>
    %5 = arith.addf %2, %4 : vector<512x128xf32>
    %cst_5 = arith.constant 0.000000e+00 : f32
    %6 = vector.broadcast %cst_5 : f32 to vector<512x128xf32>
    %7 = arith.maximumf %5, %6 : vector<512x128xf32>
    %c0_6 = arith.constant 0 : index
    %c0_7 = arith.constant 0 : index
    %8 = vector.load %arg4[%c0_6, %c0_7] : memref<512x128xf32, #tpu.memory_space<vmem>>, vector<512x128xf32>
    tpu.vector_store %arg4[%c0_6, %c0_7], %7 {strides = array<i32>} : memref<512x128xf32, #tpu.memory_space<vmem>>, vector<512x128xf32>,
    return
  }
  func.func @transform_0(%arg0: i32) -> (i32, i32) {
    %c0_i32 = arith.constant 0 : i32
    %c0_i32_0 = arith.constant 0 : i32
    return %arg0, %c0_i32 : i32, i32
  }
  func.func @transform_1(%arg0: i32) -> (i32, i32) {
    %c0_i32 = arith.constant 0 : i32
    %c0_i32_0 = arith.constant 0 : i32
    %c0_i32_1 = arith.constant 0 : i32
    return %c0_i32, %c0_i32_0 : i32, i32
  }
  func.func @transform_2(%arg0: i32) -> (i32, i32) {
    %c0_i32 = arith.constant 0 : i32
    %c0_i32_0 = arith.constant 0 : i32
    %c0_i32_1 = arith.constant 0 : i32
    return %c0_i32, %c0_i32_0 : i32, i32
  }
  func.func @transform_3(%arg0: i32) -> (i32, i32) {
    %c0_i32 = arith.constant 0 : i32
    %c0_i32_0 = arith.constant 0 : i32
    return %arg0, %c0_i32 : i32, i32
  }
}

</mosaic_0001>

<bundles_post_ra>
// kernel: tpu_custom_call.1
= control target key start
LH: loop header
LB: loop body
LE: loop exit
PB: predicated region body
PF: predicated region fallthrough
CT: control target
= control target key end

     0   :  { %8 = vsyncpa [#allocation3], 0  ;;  %s1543_s0 = inlined_call_operand.hbm [shape: f32[512,512], index: 0, kind: input, shape index: {}]   ;;  %s1544_s1 = inlined_call_operand.hbm [shape: f32[512,128], index: 1, kind: input, shape index: {}]   ;;  %s1545_s2 = inlined_call_operand.vmem [shape: f32[1,128], index: 2, kind: input, shape index: {}]   ;;  %s1546_s3 = inlined_call_operand.hbm [shape: f32[512,128], index: 3, kind: output, shape index: {}]  }
   0x1   :  { %9 = vsyncpa [#allocation6], 0 }
   0x2   :  { %10 = vsyncpa [#allocation4], 0  ;;  %s1362_s12 = smov [#allocation2]  }
   0x3   :  { %s16_s13 = sshll.u32 %s1362_s12, 4  ;;  %s17_s13 = int_to_ptr.vmem [resolvable:$true] %s16_s13 }
   0x4   :  { %s1304_s14 = scalar_lea.vmem %s17_s13, 32768  ;;  %p1309_p1 = scmp.lt.s32.totalorder %s17_s13, %s17_s13 }
   0x5   :  { %p1305_p0 = scmp.ne.s32.totalorder %s17_s13, %s1304_s14  ;;  %p1310_p2 = scmp.lt.s32.totalorder %s1304_s14, %s1304_s14 }
   0x7   :  { %p1311_p3 = por %p1310_p2, %p1309_p1 }
   0x9   :  { %p1312_p4 = pnand %p1311_p3, %p1305_p0 }
   0xb   :  { %1315 = shalt.err (!%p1312_p4)
}
   0xc   :  { %s1363_s15 = smov 512   ;;  %s1364_s16 = smov 32  }
   0xd   :  { %22 = dma.hbm_to_vmem [thread:$0]  %s1543_s0, 32768, %s17_s13, [#allocation3], %s1363_s15, %s1363_s15, %s1364_s16  }
   0xe   :  { %s1365_s19 = smov [#allocation5]  }
   0xf   :  { %s28_s20 = sshll.u32 %s1365_s19, 4  ;;  %s29_s20 = int_to_ptr.vmem [resolvable:$true] %s28_s20 }
  0x10   :  { %s1324_s21 = scalar_lea.vmem %s29_s20, 8192  ;;  %p1329_p6 = scmp.lt.s32.totalorder %s29_s20, %s29_s20 }
  0x11   :  { %p1325_p5 = scmp.ne.s32.totalorder %s29_s20, %s1324_s21  ;;  %p1330_p7 = scmp.lt.s32.totalorder %s1324_s21, %s1324_s21 }
  0x13   :  { %p1331_p8 = por %p1330_p7, %p1329_p6 }
  0x15   :  { %p1332_p9 = pnand %p1331_p8, %p1325_p5 }
  0x17   :  { %1335 = shalt.err (!%p1332_p9)
}
  0x18   :  { %s1366_s22 = smov 128   ;;  %s1367_s23 = smov 8  }
  0x19   :  { %34 = dma.hbm_to_vmem [thread:$0]  %s1544_s1, 8192, %s29_s20, [#allocation6], %s1366_s22, %s1366_s22, %s1367_s23  }
  0x1a   :  { %1356 = dma.done.wait [#allocation3], 32768  }
  0x1b   :  { %1357 = vsyncadd [#allocation3], 4294934528 }
  0x1c   :  { %1358 = dma.done.wait [#allocation6], 8192  }
  0x1d   :  { %1359 = vsyncadd [#allocation6], 4294959104  ;;  %v1368_v0 = vmov 0.0   ;;  %v314_v1 = vld [vmem:[#allocation5 + $0x78] sm:$0xff]  ;;  %v313_v3 = vld [vmem:[#allocation5 + $0x70] sm:$0xff] }
  0x1e   :  { %370 = vmatprep.subr.mxu0 %v1368_v0  ;;  %755 = vmatprep.subr.mxu1 %v1368_v0  ;;  %v346_v2 = vld [vmem:[#allocation5 + $0x178] sm:$0xff]  ;;  %v345_v4 = vld [vmem:[#allocation5 + $0x170] sm:$0xff]  ;;  %v312_v5 = vld [vmem:[#allocation5 + $0x68] sm:$0xff] }
  0x1f   :  { %371 = vmatpush1.msra.mxu0 %v314_v1  ;;  %756 = vmatpush1.msra.mxu1 %v346_v2  ;;  %v344_v6 = vld [vmem:[#allocation5 + $0x168] sm:$0xff]  ;;  %v311_v7 = vld [vmem:[#allocation5 + $0x60] sm:$0xff]  ;;  %v310_v9 = vld [vmem:[#allocation5 + $0x58] sm:$0xff] }
  0x20   :  { %372 = vmatprep.subr.mxu0 %v1368_v0  ;;  %757 = vmatprep.subr.mxu1 %v1368_v0  ;;  %v343_v8 = vld [vmem:[#allocation5 + $0x160] sm:$0xff]  ;;  %v342_v10 = vld [vmem:[#allocation5 + $0x158] sm:$0xff]  ;;  %v309_v11 = vld [vmem:[#allocation5 + $0x50] sm:$0xff] }
  0x21   :  { %373 = vmatpush1.msra.mxu0 %v313_v3  ;;  %758 = vmatpush1.msra.mxu1 %v345_v4  ;;  %v341_v12 = vld [vmem:[#allocation5 + $0x150] sm:$0xff]  ;;  %v308_v13 = vld [vmem:[#allocation5 + $0x48] sm:$0xff]  ;;  %v307_v15 = vld [vmem:[#allocation5 + $0x40] sm:$0xff] }
  0x22   :  { %374 = vmatprep.subr.mxu0 %v1368_v0  ;;  %759 = vmatprep.subr.mxu1 %v1368_v0  ;;  %v340_v14 = vld [vmem:[#allocation5 + $0x148] sm:$0xff]  ;;  %v339_v16 = vld [vmem:[#allocation5 + $0x140] sm:$0xff]  ;;  %v306_v17 = vld [vmem:[#allocation5 + $0x38] sm:$0xff] }
  0x23   :  { %375 = vmatpush1.msra.mxu0 %v312_v5  ;;  %760 = vmatpush1.msra.mxu1 %v344_v6  ;;  %v338_v18 = vld [vmem:[#allocation5 + $0x138] sm:$0xff]  ;;  %v305_v19 = vld [vmem:[#allocation5 + $0x30] sm:$0xff]  ;;  %v304_v21 = vld [vmem:[#allocation5 + $0x28] sm:$0xff] }
  0x24   :  { %376 = vmatprep.subr.mxu0 %v1368_v0  ;;  %761 = vmatprep.subr.mxu1 %v1368_v0  ;;  %v337_v20 = vld [vmem:[#allocation5 + $0x130] sm:$0xff]  ;;  %v336_v22 = vld [vmem:[#allocation5 + $0x128] sm:$0xff]  ;;  %v303_v23 = vld [vmem:[#allocation5 + $0x20] sm:$0xff] }
  0x25   :  { %377 = vmatpush1.msra.mxu0 %v311_v7  ;;  %762 = vmatpush1.msra.mxu1 %v343_v8  ;;  %v335_v24 = vld [vmem:[#allocation5 + $0x120] sm:$0xff]  ;;  %v302_v25 = vld [vmem:[#allocation5 + $0x18] sm:$0xff]  ;;  %v301_v27 = vld [vmem:[#allocation5 + $0x10] sm:$0xff] }
  0x26   :  { %378 = vmatprep.subr.mxu0 %v1368_v0  ;;  %763 = vmatprep.subr.mxu1 %v1368_v0  ;;  %v334_v26 = vld [vmem:[#allocation5 + $0x118] sm:$0xff]  ;;  %v333_v28 = vld [vmem:[#allocation5 + $0x110] sm:$0xff]  ;;  %v300_v29 = vld [vmem:[#allocation5 + $0x8] sm:$0xff] }
  0x27   :  { %379 = vmatpush1.msra.mxu0 %v310_v9  ;;  %764 = vmatpush1.msra.mxu1 %v342_v10  ;;  %v332_v30 = vld [vmem:[#allocation5 + $0x108] sm:$0xff]  ;;  %v299_v31 = vld [vmem:[#allocation5] sm:$0xff]  ;;  %v330_v33 = vld [vmem:[#allocation5 + $0xf8] sm:$0xff] }
  0x28   :  { %380 = vmatprep.subr.mxu0 %v1368_v0  ;;  %765 = vmatprep.subr.mxu1 %v1368_v0  ;;  %v331_v32 = vld [vmem:[#allocation5 + $0x100] sm:$0xff]  ;;  %v362_v34 = vld [vmem:[#allocation5 + $0x1f8] sm:$0xff]  ;;  %v329_v35 = vld [vmem:[#allocation5 + $0xf0] sm:$0xff] }
  0x29   :  { %381 = vmatpush1.msra.mxu0 %v309_v11  ;;  %766 = vmatpush1.msra.mxu1 %v341_v12  ;;  %v361_v36 = vld [vmem:[#allocation5 + $0x1f0] sm:$0xff]  ;;  %v328_v37 = vld [vmem:[#allocation5 + $0xe8] sm:$0xff]  ;;  %v327_v39 = vld [vmem:[#allocation5 + $0xe0] sm:$0xff] }
  0x2a   :  { %382 = vmatprep.subr.mxu0 %v1368_v0  ;;  %767 = vmatprep.subr.mxu1 %v1368_v0  ;;  %v360_v38 = vld [vmem:[#allocation5 + $0x1e8] sm:$0xff]  ;;  %v359_v40 = vld [vmem:[#allocation5 + $0x1e0] sm:$0xff]  ;;  %v326_v41 = vld [vmem:[#allocation5 + $0xd8] sm:$0xff] }
  0x2b   :  { %383 = vmatpush1.msra.mxu0 %v308_v13  ;;  %768 = vmatpush1.msra.mxu1 %v340_v14  ;;  %v358_v42 = vld [vmem:[#allocation5 + $0x1d8] sm:$0xff]  ;;  %v325_v43 = vld [vmem:[#allocation5 + $0xd0] sm:$0xff]  ;;  %v324_v45 = vld [vmem:[#allocation5 + $0xc8] sm:$0xff] }
  0x2c   :  { %384 = vmatprep.subr.mxu0 %v1368_v0  ;;  %769 = vmatprep.subr.mxu1 %v1368_v0  ;;  %v357_v44 = vld [vmem:[#allocation5 + $0x1d0] sm:$0xff]  ;;  %v356_v46 = vld [vmem:[#allocation5 + $0x1c8] sm:$0xff]  ;;  %v323_v47 = vld [vmem:[#allocation5 + $0xc0] sm:$0xff] }
  0x2d   :  { %385 = vmatpush1.msra.mxu0 %v307_v15  ;;  %770 = vmatpush1.msra.mxu1 %v339_v16  ;;  %v355_v48 = vld [vmem:[#allocation5 + $0x1c0] sm:$0xff]  ;;  %v322_v49 = vld [vmem:[#allocation5 + $0xb8] sm:$0xff]  ;;  %v321_v51 = vld [vmem:[#allocation5 + $0xb0] sm:$0xff] }
  0x2e   :  { %386 = vmatprep.subr.mxu0 %v1368_v0  ;;  %771 = vmatprep.subr.mxu1 %v1368_v0  ;;  %v354_v50 = vld [vmem:[#allocation5 + $0x1b8] sm:$0xff]  ;;  %v353_v52 = vld [vmem:[#allocation5 + $0x1b0] sm:$0xff]  ;;  %v320_v53 = vld [vmem:[#allocation5 + $0xa8] sm:$0xff] }
  0x2f   :  { %387 = vmatpush1.msra.mxu0 %v306_v17  ;;  %772 = vmatpush1.msra.mxu1 %v338_v18  ;;  %v352_v54 = vld [vmem:[#allocation5 + $0x1a8] sm:$0xff]  ;;  %v319_v55 = vld [vmem:[#allocation5 + $0xa0] sm:$0xff]  ;;  %v318_v57 = vld [vmem:[#allocation5 + $0x98] sm:$0xff] }
  0x30   :  { %388 = vmatprep.subr.mxu0 %v1368_v0  ;;  %773 = vmatprep.subr.mxu1 %v1368_v0  ;;  %v351_v56 = vld [vmem:[#allocation5 + $0x1a0] sm:$0xff]  ;;  %v350_v58 = vld [vmem:[#allocation5 + $0x198] sm:$0xff]  ;;  %v317_v59 = vld [vmem:[#allocation5 + $0x90] sm:$0xff] }
  0x31   :  { %389 = vmatpush1.msra.mxu0 %v305_v19  ;;  %774 = vmatpush1.msra.mxu1 %v337_v20  ;;  %v349_v60 = vld [vmem:[#allocation5 + $0x190] sm:$0xff]  ;;  %v316_v61 = vld [vmem:[#allocation5 + $0x88] sm:$0xff]  ;;  %v315_v63 = vld [vmem:[#allocation5 + $0x80] sm:$0xff] }
  0x32   :  { %390 = vmatprep.subr.mxu0 %v1368_v0  ;;  %775 = vmatprep.subr.mxu1 %v1368_v0  ;;  %v348_v62 = vld [vmem:[#allocation5 + $0x188] sm:$0xff]  ;;  %v347_v2 = vld [vmem:[#allocation5 + $0x180] sm:$0xff]  ;;  %v46_v3 = vld [vmem:[#allocation2 + $0x18] sm:$0xff] }
  0x33   :  { %391 = vmatpush1.msra.mxu0 %v304_v21  ;;  %776 = vmatpush1.msra.mxu1 %v336_v22  ;;  %v44_v1 = vld [vmem:[#allocation2 + $0x8] sm:$0xff]  ;;  %v43_v4 = vld [vmem:[#allocation2] sm:$0xff]  ;;  %v45_v5 = vld [vmem:[#allocation2 + $0x10] sm:$0xff] }
  0x34   :  { %392 = vmatprep.subr.mxu0 %v1368_v0  ;;  %777 = vmatprep.subr.mxu1 %v1368_v0  ;;  %v48_v6 = vld [vmem:[#allocation2 + $0x28] sm:$0xff]  ;;  %v50_v7 = vld [vmem:[#allocation2 + $0x38] sm:$0xff]  ;;  %v47_v8 = vld [vmem:[#allocation2 + $0x20] sm:$0xff] }
  0x35   :  { %393 = vmatpush1.msra.mxu0 %v303_v23  ;;  %778 = vmatpush1.msra.mxu1 %v335_v24  ;;  %v49_v9 = vld [vmem:[#allocation2 + $0x30] sm:$0xff]  ;;  %v52_v10 = vld [vmem:[#allocation2 + $0x48] sm:$0xff]  ;;  %v54_v11 = vld [vmem:[#allocation2 + $0x58] sm:$0xff] }
  0x36   :  { %394 = vmatprep.subr.mxu0 %v1368_v0  ;;  %779 = vmatprep.subr.mxu1 %v1368_v0  ;;  %v53_v12 = vld [vmem:[#allocation2 + $0x50] sm:$0xff]  ;;  %v56_v13 = vld [vmem:[#allocation2 + $0x68] sm:$0xff]  ;;  %v58_v14 = vld [vmem:[#allocation2 + $0x78] sm:$0xff] }
  0x37   :  { %395 = vmatpush1.msra.mxu0 %v302_v25  ;;  %780 = vmatpush1.msra.mxu1 %v334_v26  ;;  %v55_v15 = vld [vmem:[#allocation2 + $0x60] sm:$0xff]  ;;  %v57_v16 = vld [vmem:[#allocation2 + $0x70] sm:$0xff]  ;;  %v60_v17 = vld [vmem:[#allocation2 + $0x88] sm:$0xff] }
  0x38   :  { %396 = vmatprep.subr.mxu0 %v1368_v0  ;;  %781 = vmatprep.subr.mxu1 %v1368_v0  ;;  %v62_v18 = vld [vmem:[#allocation2 + $0x98] sm:$0xff]  ;;  %v59_v19 = vld [vmem:[#allocation2 + $0x80] sm:$0xff]  ;;  %v61_v20 = vld [vmem:[#allocation2 + $0x90] sm:$0xff] }
  0x39   :  { %397 = vmatpush1.msra.mxu0 %v301_v27  ;;  %782 = vmatpush1.msra.mxu1 %v333_v28  ;;  %v64_v21 = vld [vmem:[#allocation2 + $0xa8] sm:$0xff]  ;;  %v66_v22 = vld [vmem:[#allocation2 + $0xb8] sm:$0xff]  ;;  %v63_v23 = vld [vmem:[#allocation2 + $0xa0] sm:$0xff] }
  0x3a   :  { %398 = vmatprep.subr.mxu0 %v1368_v0  ;;  %783 = vmatprep.subr.mxu1 %v1368_v0  ;;  %v65_v24 = vld [vmem:[#allocation2 + $0xb0] sm:$0xff]  ;;  %v68_v25 = vld [vmem:[#allocation2 + $0xc8] sm:$0xff]  ;;  %v70_v26 = vld [vmem:[#allocation2 + $0xd8] sm:$0xff] }
  0x3b   :  { %399 = vmatpush1.msra.mxu0 %v300_v29  ;;  %784 = vmatpush1.msra.mxu1 %v332_v30  ;;  %v67_v27 = vld [vmem:[#allocation2 + $0xc0] sm:$0xff]  ;;  %v69_v28 = vld [vmem:[#allocation2 + $0xd0] sm:$0xff]  ;;  %v72_v29 = vld [vmem:[#allocation2 + $0xe8] sm:$0xff] }
  0x3c   :  { %400 = vmatprep.subr.mxu0 %v1368_v0  ;;  %785 = vmatprep.subr.mxu1 %v1368_v0  ;;  %v74_v30 = vld [vmem:[#allocation2 + $0xf8] sm:$0xff] }
  0x3d   :  { %401 = vmatpush1.msra.mxu0 %v299_v31  ;;  %786 = vmatpush1.msra.mxu1 %v331_v32  ;;  %v71_v31 = vld [vmem:[#allocation2 + $0xe0] sm:$0xff]  ;;  %v73_v32 = vld [vmem:[#allocation2 + $0xf0] sm:$0xff] }
  0x3e   :  { %402 = vmatprep.subr.mxu0 %v1368_v0  ;;  %787 = vmatprep.subr.mxu1 %v1368_v0 }
  0x3f   :  { %403 = vmatpush2.msra.mxu0 %v330_v33  ;;  %788 = vmatpush2.msra.mxu1 %v362_v34  ;;  %v76_v33 = vld [vmem:[#allocation2 + $0x108] sm:$0xff]  ;;  %v78_v34 = vld [vmem:[#allocation2 + $0x118] sm:$0xff] }
  0x40   :  { %404 = vmatprep.subr.mxu0 %v1368_v0  ;;  %789 = vmatprep.subr.mxu1 %v1368_v0 }
  0x41   :  { %405 = vmatpush2.msra.mxu0 %v329_v35  ;;  %790 = vmatpush2.msra.mxu1 %v361_v36  ;;  %v75_v35 = vld [vmem:[#allocation2 + $0x100] sm:$0xff]  ;;  %v77_v36 = vld [vmem:[#allocation2 + $0x110] sm:$0xff] }
  0x42   :  { %406 = vmatprep.subr.mxu0 %v1368_v0  ;;  %791 = vmatprep.subr.mxu1 %v1368_v0 }
  0x43   :  { %407 = vmatpush2.msra.mxu0 %v328_v37  ;;  %792 = vmatpush2.msra.mxu1 %v360_v38  ;;  %v80_v37 = vld [vmem:[#allocation2 + $0x128] sm:$0xff]  ;;  %v82_v38 = vld [vmem:[#allocation2 + $0x138] sm:$0xff] }
  0x44   :  { %408 = vmatprep.subr.mxu0 %v1368_v0  ;;  %793 = vmatprep.subr.mxu1 %v1368_v0 }
  0x45   :  { %409 = vmatpush2.msra.mxu0 %v327_v39  ;;  %794 = vmatpush2.msra.mxu1 %v359_v40  ;;  %v79_v39 = vld [vmem:[#allocation2 + $0x120] sm:$0xff]  ;;  %v81_v40 = vld [vmem:[#allocation2 + $0x130] sm:$0xff] }
  0x46   :  { %410 = vmatprep.subr.mxu0 %v1368_v0  ;;  %795 = vmatprep.subr.mxu1 %v1368_v0 }
  0x47   :  { %411 = vmatpush2.msra.mxu0 %v326_v41  ;;  %796 = vmatpush2.msra.mxu1 %v358_v42  ;;  %v84_v41 = vld [vmem:[#allocation2 + $0x148] sm:$0xff]  ;;  %v86_v42 = vld [vmem:[#allocation2 + $0x158] sm:$0xff] }
  0x48   :  { %412 = vmatprep.subr.mxu0 %v1368_v0  ;;  %797 = vmatprep.subr.mxu1 %v1368_v0 }
  0x49   :  { %413 = vmatpush2.msra.mxu0 %v325_v43  ;;  %798 = vmatpush2.msra.mxu1 %v357_v44  ;;  %v83_v43 = vld [vmem:[#allocation2 + $0x140] sm:$0xff]  ;;  %v85_v44 = vld [vmem:[#allocation2 + $0x150] sm:$0xff] }
  0x4a   :  { %414 = vmatprep.subr.mxu0 %v1368_v0  ;;  %799 = vmatprep.subr.mxu1 %v1368_v0 }
  0x4b   :  { %415 = vmatpush2.msra.mxu0 %v324_v45  ;;  %800 = vmatpush2.msra.mxu1 %v356_v46  ;;  %v88_v45 = vld [vmem:[#allocation2 + $0x168] sm:$0xff]  ;;  %v90_v46 = vld [vmem:[#allocation2 + $0x178] sm:$0xff] }
  0x4c   :  { %416 = vmatprep.subr.mxu0 %v1368_v0  ;;  %801 = vmatprep.subr.mxu1 %v1368_v0 }
  0x4d   :  { %417 = vmatpush2.msra.mxu0 %v323_v47  ;;  %802 = vmatpush2.msra.mxu1 %v355_v48  ;;  %v87_v47 = vld [vmem:[#allocation2 + $0x160] sm:$0xff]  ;;  %v89_v48 = vld [vmem:[#allocation2 + $0x170] sm:$0xff] }
  0x4e   :  { %418 = vmatprep.subr.mxu0 %v1368_v0  ;;  %803 = vmatprep.subr.mxu1 %v1368_v0 }
  0x4f   :  { %419 = vmatpush2.msra.mxu0 %v322_v49  ;;  %804 = vmatpush2.msra.mxu1 %v354_v50  ;;  %v92_v49 = vld [vmem:[#allocation2 + $0x188] sm:$0xff]  ;;  %v94_v50 = vld [vmem:[#allocation2 + $0x198] sm:$0xff] }
  0x50   :  { %420 = vmatprep.subr.mxu0 %v1368_v0  ;;  %805 = vmatprep.subr.mxu1 %v1368_v0 }
  0x51   :  { %421 = vmatpush2.msra.mxu0 %v321_v51  ;;  %806 = vmatpush2.msra.mxu1 %v353_v52  ;;  %v91_v51 = vld [vmem:[#allocation2 + $0x180] sm:$0xff]  ;;  %v93_v52 = vld [vmem:[#allocation2 + $0x190] sm:$0xff] }
  0x52   :  { %422 = vmatprep.subr.mxu0 %v1368_v0  ;;  %807 = vmatprep.subr.mxu1 %v1368_v0 }
  0x53   :  { %423 = vmatpush2.msra.mxu0 %v320_v53  ;;  %808 = vmatpush2.msra.mxu1 %v352_v54  ;;  %v96_v53 = vld [vmem:[#allocation2 + $0x1a8] sm:$0xff]  ;;  %v98_v54 = vld [vmem:[#allocation2 + $0x1b8] sm:$0xff] }
  0x54   :  { %424 = vmatprep.subr.mxu0 %v1368_v0  ;;  %809 = vmatprep.subr.mxu1 %v1368_v0 }
  0x55   :  { %425 = vmatpush2.msra.mxu0 %v319_v55  ;;  %810 = vmatpush2.msra.mxu1 %v351_v56  ;;  %v95_v55 = vld [vmem:[#allocation2 + $0x1a0] sm:$0xff]  ;;  %v97_v56 = vld [vmem:[#allocation2 + $0x1b0] sm:$0xff] }
  0x56   :  { %426 = vmatprep.subr.mxu0 %v1368_v0  ;;  %811 = vmatprep.subr.mxu1 %v1368_v0 }
  0x57   :  { %427 = vmatpush2.msra.mxu0 %v318_v57  ;;  %812 = vmatpush2.msra.mxu1 %v350_v58  ;;  %v100_v57 = vld [vmem:[#allocation2 + $0x1c8] sm:$0xff]  ;;  %v102_v58 = vld [vmem:[#allocation2 + $0x1d8] sm:$0xff] }
  0x58   :  { %428 = vmatprep.subr.mxu0 %v1368_v0  ;;  %813 = vmatprep.subr.mxu1 %v1368_v0 }
  0x59   :  { %429 = vmatpush2.msra.mxu0 %v317_v59  ;;  %814 = vmatpush2.msra.mxu1 %v349_v60  ;;  %v99_v59 = vld [vmem:[#allocation2 + $0x1c0] sm:$0xff]  ;;  %v101_v60 = vld [vmem:[#allocation2 + $0x1d0] sm:$0xff] }
  0x5a   :  { %430 = vmatprep.subr.mxu0 %v1368_v0  ;;  %815 = vmatprep.subr.mxu1 %v1368_v0 }
  0x5b   :  { %431 = vmatpush2.msra.mxu0 %v316_v61  ;;  %816 = vmatpush2.msra.mxu1 %v348_v62  ;;  %v104_v61 = vld [vmem:[#allocation2 + $0x1e8] sm:$0xff]  ;;  %v106_v62 = vld [vmem:[#allocation2 + $0x1f8] sm:$0xff] }
  0x5c   :  { %432 = vmatprep.subr.mxu0 %v1368_v0  ;;  %817 = vmatprep.subr.mxu1 %v1368_v0  ;;  %v51_v0 = vld [vmem:[#allocation2 + $0x40] sm:$0xff] }
  0x5d   :  { %433 = vmatpush2.msra.mxu0 %v315_v63  ;;  %434 = vmatprep.mubr.f32.mxu0 %v44_v1  ;;  %v103_v63 = vld [vmem:[#allocation2 + $0x1e0] sm:$0xff]  ;;  %v105_v1 = vld [vmem:[#allocation2 + $0x1f0] sm:$0xff] }
  0x5e   :  { %818 = vmatpush2.msra.mxu1 %v347_v2  ;;  %819 = vmatprep.mubr.f32.mxu1 %v46_v3  ;;  %v108_v2 = vld [vmem:[#allocation2 + $0x208] sm:$0xff]  ;;  %v110_v3 = vld [vmem:[#allocation2 + $0x218] sm:$0xff] }
  0x5f   :  { %435 = vmatmul.mubr.f32.vlgmr.msra.gmra.mxu0 %v43_v4  ;;  %820 = vmatmul.mubr.f32.vlgmr.msra.gmra.mxu1 %v45_v5  ;;  %v107_v4 = vld [vmem:[#allocation2 + $0x200] sm:$0xff]  ;;  %v109_v5 = vld [vmem:[#allocation2 + $0x210] sm:$0xff] }
  0x60   :  { %439 = vmatprep.mubr.f32.mxu0 %v48_v6  ;;  %824 = vmatprep.mubr.f32.mxu1 %v50_v7  ;;  %v112_v6 = vld [vmem:[#allocation2 + $0x228] sm:$0xff]  ;;  %v114_v7 = vld [vmem:[#allocation2 + $0x238] sm:$0xff] }
  0x63   :  { %440 = vmatmul.mubr.f32.gmra.mxu0 %v47_v8  ;;  %825 = vmatmul.mubr.f32.gmra.mxu1 %v49_v9  ;;  %v111_v8 = vld [vmem:[#allocation2 + $0x220] sm:$0xff]  ;;  %v113_v9 = vld [vmem:[#allocation2 + $0x230] sm:$0xff] }
  0x64   :  { %444 = vmatprep.mubr.f32.mxu0 %v52_v10  ;;  %829 = vmatprep.mubr.f32.mxu1 %v54_v11  ;;  %v116_v10 = vld [vmem:[#allocation2 + $0x248] sm:$0xff]  ;;  %v118_v11 = vld [vmem:[#allocation2 + $0x258] sm:$0xff] }
  0x67   :  { %445 = vmatmul.mubr.f32.gmra.mxu0 %v51_v0  ;;  %830 = vmatmul.mubr.f32.gmra.mxu1 %v53_v12  ;;  %v115_v0 = vld [vmem:[#allocation2 + $0x240] sm:$0xff]  ;;  %v117_v12 = vld [vmem:[#allocation2 + $0x250] sm:$0xff] }
  0x68   :  { %449 = vmatprep.mubr.f32.mxu0 %v56_v13  ;;  %834 = vmatprep.mubr.f32.mxu1 %v58_v14  ;;  %v120_v13 = vld [vmem:[#allocation2 + $0x268] sm:$0xff]  ;;  %v122_v14 = vld [vmem:[#allocation2 + $0x278] sm:$0xff] }
  0x6b   :  { %450 = vmatmul.mubr.f32.gmra.mxu0 %v55_v15  ;;  %835 = vmatmul.mubr.f32.gmra.mxu1 %v57_v16  ;;  %v119_v15 = vld [vmem:[#allocation2 + $0x260] sm:$0xff]  ;;  %v121_v16 = vld [vmem:[#allocation2 + $0x270] sm:$0xff] }
  0x6c   :  { %454 = vmatprep.mubr.f32.mxu0 %v60_v17  ;;  %839 = vmatprep.mubr.f32.mxu1 %v62_v18  ;;  %v124_v17 = vld [vmem:[#allocation2 + $0x288] sm:$0xff]  ;;  %v126_v18 = vld [vmem:[#allocation2 + $0x298] sm:$0xff] }
  0x6f   :  { %455 = vmatmul.mubr.f32.gmra.mxu0 %v59_v19  ;;  %840 = vmatmul.mubr.f32.gmra.mxu1 %v61_v20  ;;  %v123_v19 = vld [vmem:[#allocation2 + $0x280] sm:$0xff]  ;;  %v125_v20 = vld [vmem:[#allocation2 + $0x290] sm:$0xff] }
  0x70   :  { %459 = vmatprep.mubr.f32.mxu0 %v64_v21  ;;  %844 = vmatprep.mubr.f32.mxu1 %v66_v22  ;;  %v128_v21 = vld [vmem:[#allocation2 + $0x2a8] sm:$0xff]  ;;  %v130_v22 = vld [vmem:[#allocation2 + $0x2b8] sm:$0xff] }
  0x73   :  { %460 = vmatmul.mubr.f32.gmra.mxu0 %v63_v23  ;;  %845 = vmatmul.mubr.f32.gmra.mxu1 %v65_v24  ;;  %v127_v23 = vld [vmem:[#allocation2 + $0x2a0] sm:$0xff]  ;;  %v129_v24 = vld [vmem:[#allocation2 + $0x2b0] sm:$0xff] }
  0x74   :  { %464 = vmatprep.mubr.f32.mxu0 %v68_v25  ;;  %849 = vmatprep.mubr.f32.mxu1 %v70_v26  ;;  %v132_v25 = vld [vmem:[#allocation2 + $0x2c8] sm:$0xff]  ;;  %v134_v26 = vld [vmem:[#allocation2 + $0x2d8] sm:$0xff] }
  0x77   :  { %465 = vmatmul.mubr.f32.gmra.mxu0 %v67_v27  ;;  %850 = vmatmul.mubr.f32.gmra.mxu1 %v69_v28  ;;  %v131_v27 = vld [vmem:[#allocation2 + $0x2c0] sm:$0xff]  ;;  %v133_v28 = vld [vmem:[#allocation2 + $0x2d0] sm:$0xff] }
  0x78   :  { %469 = vmatprep.mubr.f32.mxu0 %v72_v29  ;;  %854 = vmatprep.mubr.f32.mxu1 %v74_v30  ;;  %v136_v29 = vld [vmem:[#allocation2 + $0x2e8] sm:$0xff]  ;;  %v138_v30 = vld [vmem:[#allocation2 + $0x2f8] sm:$0xff] }
  0x7b   :  { %470 = vmatmul.mubr.f32.gmra.mxu0 %v71_v31  ;;  %855 = vmatmul.mubr.f32.gmra.mxu1 %v73_v32  ;;  %v135_v31 = vld [vmem:[#allocation2 + $0x2e0] sm:$0xff]  ;;  %v137_v32 = vld [vmem:[#allocation2 + $0x2f0] sm:$0xff] }
  0x7c   :  { %474 = vmatprep.mubr.f32.mxu0 %v76_v33  ;;  %859 = vmatprep.mubr.f32.mxu1 %v78_v34  ;;  %v140_v33 = vld [vmem:[#allocation2 + $0x308] sm:$0xff]  ;;  %v142_v34 = vld [vmem:[#allocation2 + $0x318] sm:$0xff] }
  0x7f   :  { %475 = vmatmul.mubr.f32.gmra.mxu0 %v75_v35  ;;  %860 = vmatmul.mubr.f32.gmra.mxu1 %v77_v36  ;;  %v139_v35 = vld [vmem:[#allocation2 + $0x300] sm:$0xff]  ;;  %v141_v36 = vld [vmem:[#allocation2 + $0x310] sm:$0xff] }
  0x80   :  { %479 = vmatprep.mubr.f32.mxu0 %v80_v37  ;;  %864 = vmatprep.mubr.f32.mxu1 %v82_v38  ;;  %v144_v37 = vld [vmem:[#allocation2 + $0x328] sm:$0xff]  ;;  %v146_v38 = vld [vmem:[#allocation2 + $0x338] sm:$0xff] }
  0x83   :  { %480 = vmatmul.mubr.f32.gmra.mxu0 %v79_v39  ;;  %865 = vmatmul.mubr.f32.gmra.mxu1 %v81_v40  ;;  %v143_v39 = vld [vmem:[#allocation2 + $0x320] sm:$0xff]  ;;  %v145_v40 = vld [vmem:[#allocation2 + $0x330] sm:$0xff] }
  0x84   :  { %484 = vmatprep.mubr.f32.mxu0 %v84_v41  ;;  %869 = vmatprep.mubr.f32.mxu1 %v86_v42  ;;  %v148_v41 = vld [vmem:[#allocation2 + $0x348] sm:$0xff]  ;;  %v150_v42 = vld [vmem:[#allocation2 + $0x358] sm:$0xff] }
  0x87   :  { %485 = vmatmul.mubr.f32.gmra.mxu0 %v83_v43  ;;  %870 = vmatmul.mubr.f32.gmra.mxu1 %v85_v44  ;;  %v147_v43 = vld [vmem:[#allocation2 + $0x340] sm:$0xff]  ;;  %v149_v44 = vld [vmem:[#allocation2 + $0x350] sm:$0xff] }
  0x88   :  { %489 = vmatprep.mubr.f32.mxu0 %v88_v45  ;;  %874 = vmatprep.mubr.f32.mxu1 %v90_v46  ;;  %v152_v45 = vld [vmem:[#allocation2 + $0x368] sm:$0xff]  ;;  %v154_v46 = vld [vmem:[#allocation2 + $0x378] sm:$0xff] }
  0x8b   :  { %490 = vmatmul.mubr.f32.gmra.mxu0 %v87_v47  ;;  %875 = vmatmul.mubr.f32.gmra.mxu1 %v89_v48  ;;  %v151_v47 = vld [vmem:[#allocation2 + $0x360] sm:$0xff]  ;;  %v153_v48 = vld [vmem:[#allocation2 + $0x370] sm:$0xff] }
  0x8c   :  { %494 = vmatprep.mubr.f32.mxu0 %v92_v49  ;;  %879 = vmatprep.mubr.f32.mxu1 %v94_v50  ;;  %v156_v49 = vld [vmem:[#allocation2 + $0x388] sm:$0xff]  ;;  %v158_v50 = vld [vmem:[#allocation2 + $0x398] sm:$0xff] }
  0x8f   :  { %495 = vmatmul.mubr.f32.gmra.mxu0 %v91_v51  ;;  %880 = vmatmul.mubr.f32.gmra.mxu1 %v93_v52  ;;  %v155_v51 = vld [vmem:[#allocation2 + $0x380] sm:$0xff]  ;;  %v157_v52 = vld [vmem:[#allocation2 + $0x390] sm:$0xff] }
  0x90   :  { %499 = vmatprep.mubr.f32.mxu0 %v96_v53  ;;  %884 = vmatprep.mubr.f32.mxu1 %v98_v54  ;;  %v160_v53 = vld [vmem:[#allocation2 + $0x3a8] sm:$0xff]  ;;  %v162_v54 = vld [vmem:[#allocation2 + $0x3b8] sm:$0xff] }
  0x93   :  { %500 = vmatmul.mubr.f32.gmra.mxu0 %v95_v55  ;;  %885 = vmatmul.mubr.f32.gmra.mxu1 %v97_v56  ;;  %v159_v55 = vld [vmem:[#allocation2 + $0x3a0] sm:$0xff]  ;;  %v161_v56 = vld [vmem:[#allocation2 + $0x3b0] sm:$0xff] }
  0x94   :  { %504 = vmatprep.mubr.f32.mxu0 %v100_v57  ;;  %889 = vmatprep.mubr.f32.mxu1 %v102_v58  ;;  %v164_v57 = vld [vmem:[#allocation2 + $0x3c8] sm:$0xff]  ;;  %v166_v58 = vld [vmem:[#allocation2 + $0x3d8] sm:$0xff] }
  0x97   :  { %505 = vmatmul.mubr.f32.gmra.mxu0 %v99_v59  ;;  %890 = vmatmul.mubr.f32.gmra.mxu1 %v101_v60  ;;  %v163_v59 = vld [vmem:[#allocation2 + $0x3c0] sm:$0xff]  ;;  %v165_v60 = vld [vmem:[#allocation2 + $0x3d0] sm:$0xff] }
  0x98   :  { %509 = vmatprep.mubr.f32.mxu0 %v104_v61  ;;  %894 = vmatprep.mubr.f32.mxu1 %v106_v62  ;;  %v168_v61 = vld [vmem:[#allocation2 + $0x3e8] sm:$0xff]  ;;  %v170_v62 = vld [vmem:[#allocation2 + $0x3f8] sm:$0xff] }
  0x9b   :  { %510 = vmatmul.mubr.f32.gmra.mxu0 %v103_v63  ;;  %895 = vmatmul.mubr.f32.gmra.mxu1 %v105_v1  ;;  %v167_v63 = vld [vmem:[#allocation2 + $0x3e0] sm:$0xff]  ;;  %v169_v1 = vld [vmem:[#allocation2 + $0x3f0] sm:$0xff] }
  0x9c   :  { %514 = vmatprep.mubr.f32.mxu0 %v108_v2  ;;  %899 = vmatprep.mubr.f32.mxu1 %v110_v3  ;;  %v172_v2 = vld [vmem:[#allocation2 + $0x408] sm:$0xff]  ;;  %v174_v3 = vld [vmem:[#allocation2 + $0x418] sm:$0xff] }
  0x9f   :  { %515 = vmatmul.mubr.f32.gmra.mxu0 %v107_v4  ;;  %900 = vmatmul.mubr.f32.gmra.mxu1 %v109_v5  ;;  %v171_v4 = vld [vmem:[#allocation2 + $0x400] sm:$0xff]  ;;  %v173_v5 = vld [vmem:[#allocation2 + $0x410] sm:$0xff] }
  0xa0   :  { %519 = vmatprep.mubr.f32.mxu0 %v112_v6  ;;  %904 = vmatprep.mubr.f32.mxu1 %v114_v7  ;;  %v176_v6 = vld [vmem:[#allocation2 + $0x428] sm:$0xff]  ;;  %v178_v7 = vld [vmem:[#allocation2 + $0x438] sm:$0xff] }
  0xa3   :  { %520 = vmatmul.mubr.f32.gmra.mxu0 %v111_v8  ;;  %905 = vmatmul.mubr.f32.gmra.mxu1 %v113_v9  ;;  %v175_v8 = vld [vmem:[#allocation2 + $0x420] sm:$0xff]  ;;  %v177_v9 = vld [vmem:[#allocation2 + $0x430] sm:$0xff] }
  0xa4   :  { %524 = vmatprep.mubr.f32.mxu0 %v116_v10  ;;  %909 = vmatprep.mubr.f32.mxu1 %v118_v11  ;;  %v180_v10 = vld [vmem:[#allocation2 + $0x448] sm:$0xff]  ;;  %v182_v11 = vld [vmem:[#allocation2 + $0x458] sm:$0xff] }
  0xa7   :  { %525 = vmatmul.mubr.f32.gmra.mxu0 %v115_v0  ;;  %910 = vmatmul.mubr.f32.gmra.mxu1 %v117_v12  ;;  %v179_v0 = vld [vmem:[#allocation2 + $0x440] sm:$0xff]  ;;  %v181_v12 = vld [vmem:[#allocation2 + $0x450] sm:$0xff] }
  0xa8   :  { %529 = vmatprep.mubr.f32.mxu0 %v120_v13  ;;  %914 = vmatprep.mubr.f32.mxu1 %v122_v14  ;;  %v184_v13 = vld [vmem:[#allocation2 + $0x468] sm:$0xff]  ;;  %v186_v14 = vld [vmem:[#allocation2 + $0x478] sm:$0xff] }
  0xab   :  { %530 = vmatmul.mubr.f32.gmra.mxu0 %v119_v15  ;;  %915 = vmatmul.mubr.f32.gmra.mxu1 %v121_v16  ;;  %v183_v15 = vld [vmem:[#allocation2 + $0x460] sm:$0xff]  ;;  %v185_v16 = vld [vmem:[#allocation2 + $0x470] sm:$0xff] }
  0xac   :  { %534 = vmatprep.mubr.f32.mxu0 %v124_v17  ;;  %919 = vmatprep.mubr.f32.mxu1 %v126_v18  ;;  %v188_v17 = vld [vmem:[#allocation2 + $0x488] sm:$0xff]  ;;  %v190_v18 = vld [vmem:[#allocation2 + $0x498] sm:$0xff] }
  0xaf   :  { %535 = vmatmul.mubr.f32.gmra.mxu0 %v123_v19  ;;  %920 = vmatmul.mubr.f32.gmra.mxu1 %v125_v20  ;;  %v187_v19 = vld [vmem:[#allocation2 + $0x480] sm:$0xff]  ;;  %v189_v20 = vld [vmem:[#allocation2 + $0x490] sm:$0xff] }
  0xb0   :  { %539 = vmatprep.mubr.f32.mxu0 %v128_v21  ;;  %924 = vmatprep.mubr.f32.mxu1 %v130_v22  ;;  %v192_v21 = vld [vmem:[#allocation2 + $0x4a8] sm:$0xff]  ;;  %v194_v22 = vld [vmem:[#allocation2 + $0x4b8] sm:$0xff] }
  0xb3   :  { %540 = vmatmul.mubr.f32.gmra.mxu0 %v127_v23  ;;  %925 = vmatmul.mubr.f32.gmra.mxu1 %v129_v24  ;;  %v191_v23 = vld [vmem:[#allocation2 + $0x4a0] sm:$0xff]  ;;  %v193_v24 = vld [vmem:[#allocation2 + $0x4b0] sm:$0xff] }
  0xb4   :  { %544 = vmatprep.mubr.f32.mxu0 %v132_v25  ;;  %929 = vmatprep.mubr.f32.mxu1 %v134_v26  ;;  %v196_v25 = vld [vmem:[#allocation2 + $0x4c8] sm:$0xff]  ;;  %v198_v26 = vld [vmem:[#allocation2 + $0x4d8] sm:$0xff] }
  0xb7   :  { %545 = vmatmul.mubr.f32.gmra.mxu0 %v131_v27  ;;  %930 = vmatmul.mubr.f32.gmra.mxu1 %v133_v28  ;;  %v195_v27 = vld [vmem:[#allocation2 + $0x4c0] sm:$0xff]  ;;  %v197_v28 = vld [vmem:[#allocation2 + $0x4d0] sm:$0xff] }
  0xb8   :  { %549 = vmatprep.mubr.f32.mxu0 %v136_v29  ;;  %934 = vmatprep.mubr.f32.mxu1 %v138_v30  ;;  %v200_v29 = vld [vmem:[#allocation2 + $0x4e8] sm:$0xff]  ;;  %v202_v30 = vld [vmem:[#allocation2 + $0x4f8] sm:$0xff] }
  0xbb   :  { %550 = vmatmul.mubr.f32.gmra.mxu0 %v135_v31  ;;  %935 = vmatmul.mubr.f32.gmra.mxu1 %v137_v32  ;;  %v199_v31 = vld [vmem:[#allocation2 + $0x4e0] sm:$0xff]  ;;  %v201_v32 = vld [vmem:[#allocation2 + $0x4f0] sm:$0xff] }
  0xbc   :  { %554 = vmatprep.mubr.f32.mxu0 %v140_v33  ;;  %939 = vmatprep.mubr.f32.mxu1 %v142_v34  ;;  %v204_v33 = vld [vmem:[#allocation2 + $0x508] sm:$0xff]  ;;  %v206_v34 = vld [vmem:[#allocation2 + $0x518] sm:$0xff] }
  0xbf   :  { %555 = vmatmul.mubr.f32.gmra.mxu0 %v139_v35  ;;  %940 = vmatmul.mubr.f32.gmra.mxu1 %v141_v36  ;;  %v203_v35 = vld [vmem:[#allocation2 + $0x500] sm:$0xff]  ;;  %v205_v36 = vld [vmem:[#allocation2 + $0x510] sm:$0xff] }
  0xc0   :  { %559 = vmatprep.mubr.f32.mxu0 %v144_v37  ;;  %944 = vmatprep.mubr.f32.mxu1 %v146_v38  ;;  %v208_v37 = vld [vmem:[#allocation2 + $0x528] sm:$0xff]  ;;  %v210_v38 = vld [vmem:[#allocation2 + $0x538] sm:$0xff] }
  0xc3   :  { %560 = vmatmul.mubr.f32.gmra.mxu0 %v143_v39  ;;  %945 = vmatmul.mubr.f32.gmra.mxu1 %v145_v40  ;;  %v207_v39 = vld [vmem:[#allocation2 + $0x520] sm:$0xff]  ;;  %v209_v40 = vld [vmem:[#allocation2 + $0x530] sm:$0xff] }
  0xc4   :  { %564 = vmatprep.mubr.f32.mxu0 %v148_v41  ;;  %949 = vmatprep.mubr.f32.mxu1 %v150_v42  ;;  %v212_v41 = vld [vmem:[#allocation2 + $0x548] sm:$0xff]  ;;  %v214_v42 = vld [vmem:[#allocation2 + $0x558] sm:$0xff] }
  0xc7   :  { %565 = vmatmul.mubr.f32.gmra.mxu0 %v147_v43  ;;  %950 = vmatmul.mubr.f32.gmra.mxu1 %v149_v44  ;;  %v211_v43 = vld [vmem:[#allocation2 + $0x540] sm:$0xff]  ;;  %v213_v44 = vld [vmem:[#allocation2 + $0x550] sm:$0xff] }
  0xc8   :  { %569 = vmatprep.mubr.f32.mxu0 %v152_v45  ;;  %954 = vmatprep.mubr.f32.mxu1 %v154_v46  ;;  %v216_v45 = vld [vmem:[#allocation2 + $0x568] sm:$0xff]  ;;  %v218_v46 = vld [vmem:[#allocation2 + $0x578] sm:$0xff] }
  0xcb   :  { %570 = vmatmul.mubr.f32.gmra.mxu0 %v151_v47  ;;  %955 = vmatmul.mubr.f32.gmra.mxu1 %v153_v48  ;;  %v215_v47 = vld [vmem:[#allocation2 + $0x560] sm:$0xff]  ;;  %v217_v48 = vld [vmem:[#allocation2 + $0x570] sm:$0xff] }
  0xcc   :  { %574 = vmatprep.mubr.f32.mxu0 %v156_v49  ;;  %959 = vmatprep.mubr.f32.mxu1 %v158_v50  ;;  %v220_v49 = vld [vmem:[#allocation2 + $0x588] sm:$0xff]  ;;  %v222_v50 = vld [vmem:[#allocation2 + $0x598] sm:$0xff] }
  0xcf   :  { %575 = vmatmul.mubr.f32.gmra.mxu0 %v155_v51  ;;  %960 = vmatmul.mubr.f32.gmra.mxu1 %v157_v52  ;;  %v219_v51 = vld [vmem:[#allocation2 + $0x580] sm:$0xff]  ;;  %v221_v52 = vld [vmem:[#allocation2 + $0x590] sm:$0xff] }
  0xd0   :  { %579 = vmatprep.mubr.f32.mxu0 %v160_v53  ;;  %964 = vmatprep.mubr.f32.mxu1 %v162_v54  ;;  %v224_v53 = vld [vmem:[#allocation2 + $0x5a8] sm:$0xff]  ;;  %v226_v54 = vld [vmem:[#allocation2 + $0x5b8] sm:$0xff] }
  0xd3   :  { %580 = vmatmul.mubr.f32.gmra.mxu0 %v159_v55  ;;  %965 = vmatmul.mubr.f32.gmra.mxu1 %v161_v56  ;;  %v223_v55 = vld [vmem:[#allocation2 + $0x5a0] sm:$0xff]  ;;  %v225_v56 = vld [vmem:[#allocation2 + $0x5b0] sm:$0xff] }
  0xd4   :  { %584 = vmatprep.mubr.f32.mxu0 %v164_v57  ;;  %969 = vmatprep.mubr.f32.mxu1 %v166_v58  ;;  %v228_v57 = vld [vmem:[#allocation2 + $0x5c8] sm:$0xff]  ;;  %v230_v58 = vld [vmem:[#allocation2 + $0x5d8] sm:$0xff] }
  0xd7   :  { %585 = vmatmul.mubr.f32.gmra.mxu0 %v163_v59  ;;  %970 = vmatmul.mubr.f32.gmra.mxu1 %v165_v60  ;;  %v227_v59 = vld [vmem:[#allocation2 + $0x5c0] sm:$0xff]  ;;  %v229_v60 = vld [vmem:[#allocation2 + $0x5d0] sm:$0xff] }
  0xd8   :  { %589 = vmatprep.mubr.f32.mxu0 %v168_v61  ;;  %974 = vmatprep.mubr.f32.mxu1 %v170_v62  ;;  %v232_v61 = vld [vmem:[#allocation2 + $0x5e8] sm:$0xff]  ;;  %v234_v62 = vld [vmem:[#allocation2 + $0x5f8] sm:$0xff] }
  0xdb   :  { %590 = vmatmul.mubr.f32.gmra.mxu0 %v167_v63  ;;  %975 = vmatmul.mubr.f32.gmra.mxu1 %v169_v1  ;;  %v231_v63 = vld [vmem:[#allocation2 + $0x5e0] sm:$0xff]  ;;  %v233_v1 = vld [vmem:[#allocation2 + $0x5f0] sm:$0xff] }
  0xdc   :  { %594 = vmatprep.mubr.f32.mxu0 %v172_v2  ;;  %979 = vmatprep.mubr.f32.mxu1 %v174_v3  ;;  %v236_v2 = vld [vmem:[#allocation2 + $0x608] sm:$0xff]  ;;  %v238_v3 = vld [vmem:[#allocation2 + $0x618] sm:$0xff] }
  0xdf   :  { %595 = vmatmul.mubr.f32.gmra.mxu0 %v171_v4  ;;  %980 = vmatmul.mubr.f32.gmra.mxu1 %v173_v5  ;;  %v235_v4 = vld [vmem:[#allocation2 + $0x600] sm:$0xff]  ;;  %v237_v5 = vld [vmem:[#allocation2 + $0x610] sm:$0xff] }
  0xe0   :  { %599 = vmatprep.mubr.f32.mxu0 %v176_v6  ;;  %984 = vmatprep.mubr.f32.mxu1 %v178_v7  ;;  %v1466_v6 = vld [vmem:[%s1545_s2] ss:$0 sm:$0xff]  ;;  %v240_v7 = vld [vmem:[#allocation2 + $0x628] sm:$0xff] }
  0xe3   :  { %600 = vmatmul.mubr.f32.gmra.mxu0 %v175_v8  ;;  %985 = vmatmul.mubr.f32.gmra.mxu1 %v177_v9  ;;  %v242_v8 = vld [vmem:[#allocation2 + $0x638] sm:$0xff] }
  0xe4   :  { %604 = vmatprep.mubr.f32.mxu0 %v180_v10  ;;  %989 = vmatprep.mubr.f32.mxu1 %v182_v11 }
  0xe7   :  { %605 = vmatmul.mubr.f32.gmra.mxu0 %v179_v0  ;;  %990 = vmatmul.mubr.f32.gmra.mxu1 %v181_v12  ;;  %v239_v0 = vld [vmem:[#allocation2 + $0x620] sm:$0xff]  ;;  %v241_v12 = vld [vmem:[#allocation2 + $0x630] sm:$0xff] }
  0xe8   :  { %609 = vmatprep.mubr.f32.mxu0 %v184_v13  ;;  %994 = vmatprep.mubr.f32.mxu1 %v186_v14 }
  0xeb   :  { %610 = vmatmul.mubr.f32.gmra.mxu0 %v183_v15  ;;  %995 = vmatmul.mubr.f32.gmra.mxu1 %v185_v16  ;;  %v244_v15 = vld [vmem:[#allocation2 + $0x648] sm:$0xff]  ;;  %v246_v16 = vld [vmem:[#allocation2 + $0x658] sm:$0xff] }
  0xec   :  { %614 = vmatprep.mubr.f32.mxu0 %v188_v17  ;;  %999 = vmatprep.mubr.f32.mxu1 %v190_v18 }
  0xef   :  { %615 = vmatmul.mubr.f32.gmra.mxu0 %v187_v19  ;;  %1000 = vmatmul.mubr.f32.gmra.mxu1 %v189_v20 }
  0xf0   :  { %619 = vmatprep.mubr.f32.mxu0 %v192_v21  ;;  %1004 = vmatprep.mubr.f32.mxu1 %v194_v22  ;;  %v243_v22 = vld [vmem:[#allocation2 + $0x640] sm:$0xff] }
  0xf3   :  { %620 = vmatmul.mubr.f32.gmra.mxu0 %v191_v23  ;;  %1005 = vmatmul.mubr.f32.gmra.mxu1 %v193_v24  ;;  %v245_v23 = vld [vmem:[#allocation2 + $0x650] sm:$0xff] }
  0xf4   :  { %624 = vmatprep.mubr.f32.mxu0 %v196_v25  ;;  %1009 = vmatprep.mubr.f32.mxu1 %v198_v26  ;;  %v248_v26 = vld [vmem:[#allocation2 + $0x668] sm:$0xff] }
  0xf7   :  { %625 = vmatmul.mubr.f32.gmra.mxu0 %v195_v27  ;;  %1010 = vmatmul.mubr.f32.gmra.mxu1 %v197_v28  ;;  %v250_v27 = vld [vmem:[#allocation2 + $0x678] sm:$0xff] }
  0xf8   :  { %629 = vmatprep.mubr.f32.mxu0 %v200_v29  ;;  %1014 = vmatprep.mubr.f32.mxu1 %v202_v30 }
  0xfb   :  { %630 = vmatmul.mubr.f32.gmra.mxu0 %v199_v31  ;;  %1015 = vmatmul.mubr.f32.gmra.mxu1 %v201_v32 }
  0xfc   :  { %634 = vmatprep.mubr.f32.mxu0 %v204_v33  ;;  %1019 = vmatprep.mubr.f32.mxu1 %v206_v34  ;;  %v247_v33 = vld [vmem:[#allocation2 + $0x660] sm:$0xff]  ;;  %v249_v34 = vld [vmem:[#allocation2 + $0x670] sm:$0xff] }
  0xff   :  { %635 = vmatmul.mubr.f32.gmra.mxu0 %v203_v35  ;;  %1020 = vmatmul.mubr.f32.gmra.mxu1 %v205_v36 }
 0x100   :  { %639 = vmatprep.mubr.f32.mxu0 %v208_v37  ;;  %1024 = vmatprep.mubr.f32.mxu1 %v210_v38  ;;  %v252_v37 = vld [vmem:[#allocation2 + $0x688] sm:$0xff]  ;;  %v254_v38 = vld [vmem:[#allocation2 + $0x698] sm:$0xff] }
 0x103   :  { %640 = vmatmul.mubr.f32.gmra.mxu0 %v207_v39  ;;  %1025 = vmatmul.mubr.f32.gmra.mxu1 %v209_v40 }
 0x104   :  { %644 = vmatprep.mubr.f32.mxu0 %v212_v41  ;;  %1029 = vmatprep.mubr.f32.mxu1 %v214_v42 }
 0x107   :  { %645 = vmatmul.mubr.f32.gmra.mxu0 %v211_v43  ;;  %1030 = vmatmul.mubr.f32.gmra.mxu1 %v213_v44  ;;  %v251_v44 = vld [vmem:[#allocation2 + $0x680] sm:$0xff] }
 0x108   :  { %649 = vmatprep.mubr.f32.mxu0 %v216_v45  ;;  %1034 = vmatprep.mubr.f32.mxu1 %v218_v46  ;;  %v253_v45 = vld [vmem:[#allocation2 + $0x690] sm:$0xff] }
 0x10b   :  { %650 = vmatmul.mubr.f32.gmra.mxu0 %v215_v47  ;;  %1035 = vmatmul.mubr.f32.gmra.mxu1 %v217_v48  ;;  %v256_v48 = vld [vmem:[#allocation2 + $0x6a8] sm:$0xff] }
 0x10c   :  { %654 = vmatprep.mubr.f32.mxu0 %v220_v49  ;;  %1039 = vmatprep.mubr.f32.mxu1 %v222_v50  ;;  %v258_v49 = vld [vmem:[#allocation2 + $0x6b8] sm:$0xff] }
 0x10f   :  { %655 = vmatmul.mubr.f32.gmra.mxu0 %v219_v51  ;;  %1040 = vmatmul.mubr.f32.gmra.mxu1 %v221_v52 }
 0x110   :  { %659 = vmatprep.mubr.f32.mxu0 %v224_v53  ;;  %1044 = vmatprep.mubr.f32.mxu1 %v226_v54 }
 0x113   :  { %660 = vmatmul.mubr.f32.gmra.mxu0 %v223_v55  ;;  %1045 = vmatmul.mubr.f32.gmra.mxu1 %v225_v56  ;;  %v255_v55 = vld [vmem:[#allocation2 + $0x6a0] sm:$0xff]  ;;  %v257_v56 = vld [vmem:[#allocation2 + $0x6b0] sm:$0xff] }
 0x114   :  { %664 = vmatprep.mubr.f32.mxu0 %v228_v57  ;;  %1049 = vmatprep.mubr.f32.mxu1 %v230_v58 }
 0x117   :  { %665 = vmatmul.mubr.f32.gmra.mxu0 %v227_v59  ;;  %1050 = vmatmul.mubr.f32.gmra.mxu1 %v229_v60  ;;  %v260_v59 = vld [vmem:[#allocation2 + $0x6c8] sm:$0xff]  ;;  %v262_v60 = vld [vmem:[#allocation2 + $0x6d8] sm:$0xff] }
 0x118   :  { %669 = vmatprep.mubr.f32.mxu0 %v232_v61  ;;  %1054 = vmatprep.mubr.f32.mxu1 %v234_v62 }
 0x11b   :  { %670 = vmatmul.mubr.f32.gmra.mxu0 %v231_v63  ;;  %1055 = vmatmul.mubr.f32.gmra.mxu1 %v233_v1 }
 0x11c   :  { %674 = vmatprep.mubr.f32.mxu0 %v236_v2  ;;  %1059 = vmatprep.mubr.f32.mxu1 %v238_v3  ;;  %v259_v3 = vld [vmem:[#allocation2 + $0x6c0] sm:$0xff] }
 0x11f   :  { %v436_v9 = vpop.f32.mrf.mxu0  ;;  %675 = vmatmul.mubr.f32.gmra.mxu0 %v235_v4  ;;  %v821_v10 = vpop.f32.mrf.mxu1  ;;  %1060 = vmatmul.mubr.f32.gmra.mxu1 %v237_v5  ;;  %v261_v4 = vld [vmem:[#allocation2 + $0x6d0] sm:$0xff] }
 0x120   :  { %v437_v11 = vadd.f32 %v1466_v6, %v436_v9  ;;  %679 = vmatprep.mubr.f32.mxu0 %v240_v7  ;;  %1064 = vmatprep.mubr.f32.mxu1 %v242_v8  ;;  %v264_v8 = vld [vmem:[#allocation2 + $0x6e8] sm:$0xff]  ;;  %v266_v9 = vld [vmem:[#allocation2 + $0x6f8] sm:$0xff] }
 0x121   :  { %v438_v13 = vpop.f32.mrf.mxu0  ;;  %v823_v14 = vpop.f32.mrf.mxu1 }
 0x122   :  { %v822_v17 = vadd.f32 %v821_v10, %v437_v11  ;;  %v263_v14 = vld [vmem:[#allocation2 + $0x6e0] sm:$0xff] }
 0x123   :  { %v441_v18 = vpop.f32.mrf.mxu0  ;;  %680 = vmatmul.mubr.f32.gmra.mxu0 %v239_v0  ;;  %v826_v19 = vpop.f32.mrf.mxu1  ;;  %1065 = vmatmul.mubr.f32.gmra.mxu1 %v241_v12 }
 0x124   :  { %v1140_v20 = vmax.f32 %v822_v17, 0.0  ;;  %v442_v21 = vadd.f32 %v1466_v6, %v441_v18  ;;  %684 = vmatprep.mubr.f32.mxu0 %v244_v15  ;;  %1069 = vmatprep.mubr.f32.mxu1 %v246_v16  ;;  %v265_v15 = vld [vmem:[#allocation2 + $0x6f0] sm:$0xff]  ;;  %v268_v18 = vld [vmem:[#allocation2 + $0x708] sm:$0xff] }
 0x125   :  { %v443_v24 = vpop.f32.mrf.mxu0  ;;  %v828_v25 = vpop.f32.mrf.mxu1 }
 0x126   :  { %1204 = vst [vmem:[#allocation7] sm:$0xff] %v1140_v20  ;;  %v827_v28 = vadd.f32 %v826_v19, %v442_v21  ;;  %v270_v19 = vld [vmem:[#allocation2 + $0x718] sm:$0xff]  ;;  %v267_v25 = vld [vmem:[#allocation2 + $0x700] sm:$0xff] }
 0x127   :  { %v446_v29 = vpop.f32.mrf.mxu0  ;;  %685 = vmatmul.mubr.f32.gmra.mxu0 %v243_v22  ;;  %v831_v30 = vpop.f32.mrf.mxu1  ;;  %1070 = vmatmul.mubr.f32.gmra.mxu1 %v245_v23 }
 0x128   :  { %v1141_v31 = vmax.f32 %v827_v28, 0.0  ;;  %v447_v32 = vadd.f32 %v1466_v6, %v446_v29  ;;  %689 = vmatprep.mubr.f32.mxu0 %v248_v26  ;;  %1074 = vmatprep.mubr.f32.mxu1 %v250_v27  ;;  %v269_v26 = vld [vmem:[#allocation2 + $0x710] sm:$0xff]  ;;  %v272_v29 = vld [vmem:[#allocation2 + $0x728] sm:$0xff] }
 0x129   :  { %v448_v35 = vpop.f32.mrf.mxu0  ;;  %v833_v36 = vpop.f32.mrf.mxu1 }
 0x12a   :  { %1205 = vst [vmem:[#allocation7 + $0x8] sm:$0xff] %v1141_v31  ;;  %v832_v39 = vadd.f32 %v831_v30, %v447_v32  ;;  %v274_v30 = vld [vmem:[#allocation2 + $0x738] sm:$0xff]  ;;  %v271_v36 = vld [vmem:[#allocation2 + $0x720] sm:$0xff] }
 0x12b   :  { %v451_v40 = vpop.f32.mrf.mxu0  ;;  %690 = vmatmul.mubr.f32.gmra.mxu0 %v247_v33  ;;  %v836_v41 = vpop.f32.mrf.mxu1  ;;  %1075 = vmatmul.mubr.f32.gmra.mxu1 %v249_v34 }
 0x12c   :  { %v1142_v42 = vmax.f32 %v832_v39, 0.0  ;;  %v452_v43 = vadd.f32 %v1466_v6, %v451_v40  ;;  %694 = vmatprep.mubr.f32.mxu0 %v252_v37  ;;  %1079 = vmatprep.mubr.f32.mxu1 %v254_v38  ;;  %v273_v37 = vld [vmem:[#allocation2 + $0x730] sm:$0xff]  ;;  %v276_v40 = vld [vmem:[#allocation2 + $0x748] sm:$0xff] }
 0x12d   :  { %v453_v46 = vpop.f32.mrf.mxu0  ;;  %v838_v47 = vpop.f32.mrf.mxu1 }
 0x12e   :  { %1206 = vst [vmem:[#allocation7 + $0x10] sm:$0xff] %v1142_v42  ;;  %v837_v50 = vadd.f32 %v836_v41, %v452_v43  ;;  %v278_v41 = vld [vmem:[#allocation2 + $0x758] sm:$0xff]  ;;  %v275_v47 = vld [vmem:[#allocation2 + $0x740] sm:$0xff] }
 0x12f   :  { %v456_v51 = vpop.f32.mrf.mxu0  ;;  %695 = vmatmul.mubr.f32.gmra.mxu0 %v251_v44  ;;  %v841_v52 = vpop.f32.mrf.mxu1  ;;  %1080 = vmatmul.mubr.f32.gmra.mxu1 %v253_v45 }
 0x130   :  { %v1143_v53 = vmax.f32 %v837_v50, 0.0  ;;  %v457_v54 = vadd.f32 %v1466_v6, %v456_v51  ;;  %699 = vmatprep.mubr.f32.mxu0 %v256_v48  ;;  %1084 = vmatprep.mubr.f32.mxu1 %v258_v49  ;;  %v277_v48 = vld [vmem:[#allocation2 + $0x750] sm:$0xff]  ;;  %v280_v51 = vld [vmem:[#allocation2 + $0x768] sm:$0xff] }
 0x131   :  { %v458_v57 = vpop.f32.mrf.mxu0  ;;  %v843_v58 = vpop.f32.mrf.mxu1 }
 0x132   :  { %1207 = vst [vmem:[#allocation7 + $0x18] sm:$0xff] %v1143_v53  ;;  %v842_v61 = vadd.f32 %v841_v52, %v457_v54  ;;  %v282_v52 = vld [vmem:[#allocation2 + $0x778] sm:$0xff]  ;;  %v279_v58 = vld [vmem:[#allocation2 + $0x760] sm:$0xff] }
 0x133   :  { %v461_v62 = vpop.f32.mrf.mxu0  ;;  %700 = vmatmul.mubr.f32.gmra.mxu0 %v255_v55  ;;  %v846_v63 = vpop.f32.mrf.mxu1  ;;  %1085 = vmatmul.mubr.f32.gmra.mxu1 %v257_v56 }
 0x134   :  { %v1144_v1 = vmax.f32 %v842_v61, 0.0  ;;  %v462_v2 = vadd.f32 %v1466_v6, %v461_v62  ;;  %704 = vmatprep.mubr.f32.mxu0 %v260_v59  ;;  %1089 = vmatprep.mubr.f32.mxu1 %v262_v60  ;;  %v281_v59 = vld [vmem:[#allocation2 + $0x770] sm:$0xff]  ;;  %v284_v62 = vld [vmem:[#allocation2 + $0x788] sm:$0xff] }
 0x135   :  { %v463_v5 = vpop.f32.mrf.mxu0  ;;  %v848_v7 = vpop.f32.mrf.mxu1 }
 0x136   :  { %1208 = vst [vmem:[#allocation7 + $0x20] sm:$0xff] %v1144_v1  ;;  %v847_v10 = vadd.f32 %v846_v63, %v462_v2  ;;  %v286_v63 = vld [vmem:[#allocation2 + $0x798] sm:$0xff]  ;;  %v283_v7 = vld [vmem:[#allocation2 + $0x780] sm:$0xff] }
 0x137   :  { %v466_v11 = vpop.f32.mrf.mxu0  ;;  %705 = vmatmul.mubr.f32.gmra.mxu0 %v259_v3  ;;  %v851_v0 = vpop.f32.mrf.mxu1  ;;  %1090 = vmatmul.mubr.f32.gmra.mxu1 %v261_v4 }
 0x138   :  { %v1145_v12 = vmax.f32 %v847_v10, 0.0  ;;  %v467_v13 = vadd.f32 %v1466_v6, %v466_v11  ;;  %709 = vmatprep.mubr.f32.mxu0 %v264_v8  ;;  %1094 = vmatprep.mubr.f32.mxu1 %v266_v9  ;;  %v285_v8 = vld [vmem:[#allocation2 + $0x790] sm:$0xff]  ;;  %v288_v11 = vld [vmem:[#allocation2 + $0x7a8] sm:$0xff] }
 0x139   :  { %v468_v16 = vpop.f32.mrf.mxu0  ;;  %v853_v17 = vpop.f32.mrf.mxu1 }
 0x13a   :  { %1209 = vst [vmem:[#allocation7 + $0x28] sm:$0xff] %v1145_v12  ;;  %v852_v20 = vadd.f32 %v851_v0, %v467_v13  ;;  %v290_v0 = vld [vmem:[#allocation2 + $0x7b8] sm:$0xff]  ;;  %v287_v17 = vld [vmem:[#allocation2 + $0x7a0] sm:$0xff] }
 0x13b   :  { %v471_v21 = vpop.f32.mrf.mxu0  ;;  %710 = vmatmul.mubr.f32.gmra.mxu0 %v263_v14  ;;  %v856_v22 = vpop.f32.mrf.mxu1  ;;  %1095 = vmatmul.mubr.f32.gmra.mxu1 %v265_v15 }
 0x13c   :  { %v1146_v23 = vmax.f32 %v852_v20, 0.0  ;;  %v472_v24 = vadd.f32 %v1466_v6, %v471_v21  ;;  %714 = vmatprep.mubr.f32.mxu0 %v268_v18  ;;  %1099 = vmatprep.mubr.f32.mxu1 %v270_v19  ;;  %v289_v18 = vld [vmem:[#allocation2 + $0x7b0] sm:$0xff]  ;;  %v292_v21 = vld [vmem:[#allocation2 + $0x7c8] sm:$0xff] }
 0x13d   :  { %v473_v27 = vpop.f32.mrf.mxu0  ;;  %v858_v28 = vpop.f32.mrf.mxu1 }
 0x13e   :  { %1210 = vst [vmem:[#allocation7 + $0x30] sm:$0xff] %v1146_v23  ;;  %v857_v31 = vadd.f32 %v856_v22, %v472_v24  ;;  %v294_v22 = vld [vmem:[#allocation2 + $0x7d8] sm:$0xff]  ;;  %v291_v28 = vld [vmem:[#allocation2 + $0x7c0] sm:$0xff] }
 0x13f   :  { %v476_v32 = vpop.f32.mrf.mxu0  ;;  %715 = vmatmul.mubr.f32.gmra.mxu0 %v267_v25  ;;  %v861_v33 = vpop.f32.mrf.mxu1  ;;  %1100 = vmatmul.mubr.f32.gmra.mxu1 %v269_v26 }
 0x140   :  { %v1147_v34 = vmax.f32 %v857_v31, 0.0  ;;  %v477_v35 = vadd.f32 %v1466_v6, %v476_v32  ;;  %719 = vmatprep.mubr.f32.mxu0 %v272_v29  ;;  %1104 = vmatprep.mubr.f32.mxu1 %v274_v30  ;;  %v293_v29 = vld [vmem:[#allocation2 + $0x7d0] sm:$0xff]  ;;  %v296_v32 = vld [vmem:[#allocation2 + $0x7e8] sm:$0xff] }
 0x141   :  { %v478_v38 = vpop.f32.mrf.mxu0  ;;  %v863_v39 = vpop.f32.mrf.mxu1 }
 0x142   :  { %1211 = vst [vmem:[#allocation7 + $0x38] sm:$0xff] %v1147_v34  ;;  %v862_v42 = vadd.f32 %v861_v33, %v477_v35  ;;  %v298_v33 = vld [vmem:[#allocation2 + $0x7f8] sm:$0xff]  ;;  %v295_v39 = vld [vmem:[#allocation2 + $0x7e0] sm:$0xff] }
 0x143   :  { %v481_v43 = vpop.f32.mrf.mxu0  ;;  %720 = vmatmul.mubr.f32.gmra.mxu0 %v271_v36  ;;  %v866_v44 = vpop.f32.mrf.mxu1  ;;  %1105 = vmatmul.mubr.f32.gmra.mxu1 %v273_v37 }
 0x144   :  { %v1148_v45 = vmax.f32 %v862_v42, 0.0  ;;  %v482_v46 = vadd.f32 %v1466_v6, %v481_v43  ;;  %724 = vmatprep.mubr.f32.mxu0 %v276_v40  ;;  %1109 = vmatprep.mubr.f32.mxu1 %v278_v41  ;;  %v297_v40 = vld [vmem:[#allocation2 + $0x7f0] sm:$0xff] }
 0x145   :  { %v483_v49 = vpop.f32.mrf.mxu0  ;;  %v868_v50 = vpop.f32.mrf.mxu1 }
 0x146   :  { %1212 = vst [vmem:[#allocation7 + $0x40] sm:$0xff] %v1148_v45  ;;  %v867_v53 = vadd.f32 %v866_v44, %v482_v46 }
 0x147   :  { %v486_v54 = vpop.f32.mrf.mxu0  ;;  %725 = vmatmul.mubr.f32.gmra.mxu0 %v275_v47  ;;  %v871_v55 = vpop.f32.mrf.mxu1  ;;  %1110 = vmatmul.mubr.f32.gmra.mxu1 %v277_v48 }
 0x148   :  { %v1149_v56 = vmax.f32 %v867_v53, 0.0  ;;  %v487_v57 = vadd.f32 %v1466_v6, %v486_v54  ;;  %729 = vmatprep.mubr.f32.mxu0 %v280_v51  ;;  %1114 = vmatprep.mubr.f32.mxu1 %v282_v52 }
 0x149   :  { %v488_v60 = vpop.f32.mrf.mxu0  ;;  %v873_v61 = vpop.f32.mrf.mxu1 }
 0x14a   :  { %1213 = vst [vmem:[#allocation7 + $0x48] sm:$0xff] %v1149_v56  ;;  %v872_v1 = vadd.f32 %v871_v55, %v487_v57 }
 0x14b   :  { %v491_v2 = vpop.f32.mrf.mxu0  ;;  %730 = vmatmul.mubr.f32.gmra.mxu0 %v279_v58  ;;  %v876_v3 = vpop.f32.mrf.mxu1  ;;  %1115 = vmatmul.mubr.f32.gmra.mxu1 %v281_v59 }
 0x14c   :  { %v1150_v4 = vmax.f32 %v872_v1, 0.0  ;;  %v492_v5 = vadd.f32 %v1466_v6, %v491_v2  ;;  %734 = vmatprep.mubr.f32.mxu0 %v284_v62  ;;  %1119 = vmatprep.mubr.f32.mxu1 %v286_v63 }
 0x14d   :  { %v493_v9 = vpop.f32.mrf.mxu0  ;;  %v878_v10 = vpop.f32.mrf.mxu1 }
 0x14e   :  { %1214 = vst [vmem:[#allocation7 + $0x50] sm:$0xff] %v1150_v4  ;;  %v877_v12 = vadd.f32 %v876_v3, %v492_v5 }
 0x14f   :  { %v496_v13 = vpop.f32.mrf.mxu0  ;;  %735 = vmatmul.mubr.f32.gmra.mxu0 %v283_v7  ;;  %v881_v14 = vpop.f32.mrf.mxu1  ;;  %1120 = vmatmul.mubr.f32.gmra.mxu1 %v285_v8 }
 0x150   :  { %v1151_v15 = vmax.f32 %v877_v12, 0.0  ;;  %v497_v16 = vadd.f32 %v1466_v6, %v496_v13  ;;  %739 = vmatprep.mubr.f32.mxu0 %v288_v11  ;;  %1124 = vmatprep.mubr.f32.mxu1 %v290_v0 }
 0x151   :  { %v498_v19 = vpop.f32.mrf.mxu0  ;;  %v883_v20 = vpop.f32.mrf.mxu1 }
 0x152   :  { %1215 = vst [vmem:[#allocation7 + $0x58] sm:$0xff] %v1151_v15  ;;  %v882_v23 = vadd.f32 %v881_v14, %v497_v16 }
 0x153   :  { %v501_v24 = vpop.f32.mrf.mxu0  ;;  %740 = vmatmul.mubr.f32.gmra.mxu0 %v287_v17  ;;  %v886_v25 = vpop.f32.mrf.mxu1  ;;  %1125 = vmatmul.mubr.f32.gmra.mxu1 %v289_v18 }
 0x154   :  { %v1152_v26 = vmax.f32 %v882_v23, 0.0  ;;  %v502_v27 = vadd.f32 %v1466_v6, %v501_v24  ;;  %744 = vmatprep.mubr.f32.mxu0 %v292_v21  ;;  %1129 = vmatprep.mubr.f32.mxu1 %v294_v22 }
 0x155   :  { %v503_v30 = vpop.f32.mrf.mxu0  ;;  %v888_v31 = vpop.f32.mrf.mxu1 }
 0x156   :  { %1216 = vst [vmem:[#allocation7 + $0x60] sm:$0xff] %v1152_v26  ;;  %v887_v34 = vadd.f32 %v886_v25, %v502_v27 }
 0x157   :  { %v506_v35 = vpop.f32.mrf.mxu0  ;;  %745 = vmatmul.mubr.f32.gmra.mxu0 %v291_v28  ;;  %v891_v36 = vpop.f32.mrf.mxu1  ;;  %1130 = vmatmul.mubr.f32.gmra.mxu1 %v293_v29 }
 0x158   :  { %v1153_v37 = vmax.f32 %v887_v34, 0.0  ;;  %v507_v38 = vadd.f32 %v1466_v6, %v506_v35  ;;  %749 = vmatprep.mubr.f32.mxu0 %v296_v32  ;;  %1134 = vmatprep.mubr.f32.mxu1 %v298_v33 }
 0x159   :  { %v508_v41 = vpop.f32.mrf.mxu0  ;;  %v893_v42 = vpop.f32.mrf.mxu1 }
 0x15a   :  { %1217 = vst [vmem:[#allocation7 + $0x68] sm:$0xff] %v1153_v37  ;;  %v892_v43 = vadd.f32 %v891_v36, %v507_v38 }
 0x15b   :  { %v511_v44 = vpop.f32.mrf.mxu0  ;;  %750 = vmatmul.mubr.f32.gmra.mxu0 %v295_v39  ;;  %v896_v45 = vpop.f32.mrf.mxu1  ;;  %1135 = vmatmul.mubr.f32.gmra.mxu1 %v297_v40 }
 0x15c   :  { %v1154_v46 = vmax.f32 %v892_v43, 0.0  ;;  %v512_v47 = vadd.f32 %v1466_v6, %v511_v44 }
 0x15d   :  { %v513_v48 = vpop.f32.mrf.mxu0  ;;  %v898_v49 = vpop.f32.mrf.mxu1 }
 0x15e   :  { %1218 = vst [vmem:[#allocation7 + $0x70] sm:$0xff] %v1154_v46  ;;  %v897_v50 = vadd.f32 %v896_v45, %v512_v47 }
 0x15f   :  { %v516_v51 = vpop.f32.mrf.mxu0  ;;  %v901_v52 = vpop.f32.mrf.mxu1 }
 0x160   :  { %v1155_v53 = vmax.f32 %v897_v50, 0.0  ;;  %v517_v54 = vadd.f32 %v1466_v6, %v516_v51 }
 0x161   :  { %v518_v55 = vpop.f32.mrf.mxu0  ;;  %v903_v56 = vpop.f32.mrf.mxu1 }
 0x162   :  { %1219 = vst [vmem:[#allocation7 + $0x78] sm:$0xff] %v1155_v53  ;;  %v902_v57 = vadd.f32 %v901_v52, %v517_v54 }
 0x163   :  { %v521_v58 = vpop.f32.mrf.mxu0  ;;  %v906_v59 = vpop.f32.mrf.mxu1 }
 0x164   :  { %v1156_v60 = vmax.f32 %v902_v57, 0.0  ;;  %v522_v61 = vadd.f32 %v1466_v6, %v521_v58 }
 0x165   :  { %v523_v62 = vpop.f32.mrf.mxu0  ;;  %v908_v63 = vpop.f32.mrf.mxu1 }
 0x166   :  { %1220 = vst [vmem:[#allocation7 + $0x80] sm:$0xff] %v1156_v60  ;;  %v907_v1 = vadd.f32 %v906_v59, %v522_v61 }
 0x167   :  { %v526_v2 = vpop.f32.mrf.mxu0  ;;  %v911_v3 = vpop.f32.mrf.mxu1 }
 0x168   :  { %v1157_v4 = vmax.f32 %v907_v1, 0.0  ;;  %v527_v5 = vadd.f32 %v1466_v6, %v526_v2 }
 0x169   :  { %v528_v7 = vpop.f32.mrf.mxu0  ;;  %v913_v8 = vpop.f32.mrf.mxu1 }
 0x16a   :  { %1221 = vst [vmem:[#allocation7 + $0x88] sm:$0xff] %v1157_v4  ;;  %v912_v9 = vadd.f32 %v911_v3, %v527_v5 }
 0x16b   :  { %v531_v10 = vpop.f32.mrf.mxu0  ;;  %v916_v11 = vpop.f32.mrf.mxu1 }
 0x16c   :  { %v1158_v0 = vmax.f32 %v912_v9, 0.0  ;;  %v532_v12 = vadd.f32 %v1466_v6, %v531_v10 }
 0x16d   :  { %v533_v13 = vpop.f32.mrf.mxu0  ;;  %v918_v14 = vpop.f32.mrf.mxu1 }
 0x16e   :  { %1222 = vst [vmem:[#allocation7 + $0x90] sm:$0xff] %v1158_v0  ;;  %v917_v15 = vadd.f32 %v916_v11, %v532_v12 }
 0x16f   :  { %v536_v16 = vpop.f32.mrf.mxu0  ;;  %v921_v17 = vpop.f32.mrf.mxu1 }
 0x170   :  { %v1159_v18 = vmax.f32 %v917_v15, 0.0  ;;  %v537_v19 = vadd.f32 %v1466_v6, %v536_v16 }
 0x171   :  { %v538_v20 = vpop.f32.mrf.mxu0  ;;  %v923_v21 = vpop.f32.mrf.mxu1 }
 0x172   :  { %1223 = vst [vmem:[#allocation7 + $0x98] sm:$0xff] %v1159_v18  ;;  %v922_v22 = vadd.f32 %v921_v17, %v537_v19 }
 0x173   :  { %v541_v23 = vpop.f32.mrf.mxu0  ;;  %v926_v24 = vpop.f32.mrf.mxu1 }
 0x174   :  { %v1160_v25 = vmax.f32 %v922_v22, 0.0  ;;  %v542_v26 = vadd.f32 %v1466_v6, %v541_v23 }
 0x175   :  { %v543_v27 = vpop.f32.mrf.mxu0  ;;  %v928_v28 = vpop.f32.mrf.mxu1 }
 0x176   :  { %1224 = vst [vmem:[#allocation7 + $0xa0] sm:$0xff] %v1160_v25  ;;  %v927_v29 = vadd.f32 %v926_v24, %v542_v26 }
 0x177   :  { %v546_v30 = vpop.f32.mrf.mxu0  ;;  %v931_v31 = vpop.f32.mrf.mxu1 }
 0x178   :  { %v1161_v32 = vmax.f32 %v927_v29, 0.0  ;;  %v547_v33 = vadd.f32 %v1466_v6, %v546_v30 }
 0x179   :  { %v548_v34 = vpop.f32.mrf.mxu0  ;;  %v933_v35 = vpop.f32.mrf.mxu1 }
 0x17a   :  { %1225 = vst [vmem:[#allocation7 + $0xa8] sm:$0xff] %v1161_v32  ;;  %v932_v36 = vadd.f32 %v931_v31, %v547_v33 }
 0x17b   :  { %v551_v37 = vpop.f32.mrf.mxu0  ;;  %v936_v38 = vpop.f32.mrf.mxu1 }
 0x17c   :  { %v1162_v39 = vmax.f32 %v932_v36, 0.0  ;;  %v552_v40 = vadd.f32 %v1466_v6, %v551_v37 }
 0x17d   :  { %v553_v41 = vpop.f32.mrf.mxu0  ;;  %v938_v42 = vpop.f32.mrf.mxu1 }
 0x17e   :  { %1226 = vst [vmem:[#allocation7 + $0xb0] sm:$0xff] %v1162_v39  ;;  %v937_v43 = vadd.f32 %v936_v38, %v552_v40 }
 0x17f   :  { %v556_v44 = vpop.f32.mrf.mxu0  ;;  %v941_v45 = vpop.f32.mrf.mxu1 }
 0x180   :  { %v1163_v46 = vmax.f32 %v937_v43, 0.0  ;;  %v557_v47 = vadd.f32 %v1466_v6, %v556_v44 }
 0x181   :  { %v558_v48 = vpop.f32.mrf.mxu0  ;;  %v943_v49 = vpop.f32.mrf.mxu1 }
 0x182   :  { %1227 = vst [vmem:[#allocation7 + $0xb8] sm:$0xff] %v1163_v46  ;;  %v942_v50 = vadd.f32 %v941_v45, %v557_v47 }
 0x183   :  { %v561_v51 = vpop.f32.mrf.mxu0  ;;  %v946_v52 = vpop.f32.mrf.mxu1 }
 0x184   :  { %v1164_v53 = vmax.f32 %v942_v50, 0.0  ;;  %v562_v54 = vadd.f32 %v1466_v6, %v561_v51 }
 0x185   :  { %v563_v55 = vpop.f32.mrf.mxu0  ;;  %v948_v56 = vpop.f32.mrf.mxu1 }
 0x186   :  { %1228 = vst [vmem:[#allocation7 + $0xc0] sm:$0xff] %v1164_v53  ;;  %v947_v57 = vadd.f32 %v946_v52, %v562_v54 }
 0x187   :  { %v566_v58 = vpop.f32.mrf.mxu0  ;;  %v951_v59 = vpop.f32.mrf.mxu1 }
 0x188   :  { %v1165_v60 = vmax.f32 %v947_v57, 0.0  ;;  %v567_v61 = vadd.f32 %v1466_v6, %v566_v58 }
 0x189   :  { %v568_v62 = vpop.f32.mrf.mxu0  ;;  %v953_v63 = vpop.f32.mrf.mxu1 }
 0x18a   :  { %1229 = vst [vmem:[#allocation7 + $0xc8] sm:$0xff] %v1165_v60  ;;  %v952_v1 = vadd.f32 %v951_v59, %v567_v61 }
 0x18b   :  { %v571_v2 = vpop.f32.mrf.mxu0  ;;  %v956_v3 = vpop.f32.mrf.mxu1 }
 0x18c   :  { %v1166_v4 = vmax.f32 %v952_v1, 0.0  ;;  %v572_v5 = vadd.f32 %v1466_v6, %v571_v2 }
 0x18d   :  { %v573_v7 = vpop.f32.mrf.mxu0  ;;  %v958_v8 = vpop.f32.mrf.mxu1 }
 0x18e   :  { %1230 = vst [vmem:[#allocation7 + $0xd0] sm:$0xff] %v1166_v4  ;;  %v957_v9 = vadd.f32 %v956_v3, %v572_v5 }
 0x18f   :  { %v576_v10 = vpop.f32.mrf.mxu0  ;;  %v961_v11 = vpop.f32.mrf.mxu1 }
 0x190   :  { %v1167_v0 = vmax.f32 %v957_v9, 0.0  ;;  %v577_v12 = vadd.f32 %v1466_v6, %v576_v10 }
 0x191   :  { %v578_v13 = vpop.f32.mrf.mxu0  ;;  %v963_v14 = vpop.f32.mrf.mxu1 }
 0x192   :  { %1231 = vst [vmem:[#allocation7 + $0xd8] sm:$0xff] %v1167_v0  ;;  %v962_v15 = vadd.f32 %v961_v11, %v577_v12 }
 0x193   :  { %v581_v16 = vpop.f32.mrf.mxu0  ;;  %v966_v17 = vpop.f32.mrf.mxu1 }
 0x194   :  { %v1168_v18 = vmax.f32 %v962_v15, 0.0  ;;  %v582_v19 = vadd.f32 %v1466_v6, %v581_v16 }
 0x195   :  { %v583_v20 = vpop.f32.mrf.mxu0  ;;  %v968_v21 = vpop.f32.mrf.mxu1 }
 0x196   :  { %1232 = vst [vmem:[#allocation7 + $0xe0] sm:$0xff] %v1168_v18  ;;  %v967_v22 = vadd.f32 %v966_v17, %v582_v19 }
 0x197   :  { %v586_v23 = vpop.f32.mrf.mxu0  ;;  %v971_v24 = vpop.f32.mrf.mxu1 }
 0x198   :  { %v1169_v25 = vmax.f32 %v967_v22, 0.0  ;;  %v587_v26 = vadd.f32 %v1466_v6, %v586_v23 }
 0x199   :  { %v588_v27 = vpop.f32.mrf.mxu0  ;;  %v973_v28 = vpop.f32.mrf.mxu1 }
 0x19a   :  { %1233 = vst [vmem:[#allocation7 + $0xe8] sm:$0xff] %v1169_v25  ;;  %v972_v29 = vadd.f32 %v971_v24, %v587_v26 }
 0x19b   :  { %v591_v30 = vpop.f32.mrf.mxu0  ;;  %v976_v31 = vpop.f32.mrf.mxu1 }
 0x19c   :  { %v1170_v32 = vmax.f32 %v972_v29, 0.0  ;;  %v592_v33 = vadd.f32 %v1466_v6, %v591_v30 }
 0x19d   :  { %v593_v34 = vpop.f32.mrf.mxu0  ;;  %v978_v35 = vpop.f32.mrf.mxu1 }
 0x19e   :  { %1234 = vst [vmem:[#allocation7 + $0xf0] sm:$0xff] %v1170_v32  ;;  %v977_v36 = vadd.f32 %v976_v31, %v592_v33 }
 0x19f   :  { %v596_v37 = vpop.f32.mrf.mxu0  ;;  %v981_v38 = vpop.f32.mrf.mxu1 }
 0x1a0   :  { %v1171_v39 = vmax.f32 %v977_v36, 0.0  ;;  %v597_v40 = vadd.f32 %v1466_v6, %v596_v37 }
 0x1a1   :  { %v598_v41 = vpop.f32.mrf.mxu0  ;;  %v983_v42 = vpop.f32.mrf.mxu1 }
 0x1a2   :  { %1235 = vst [vmem:[#allocation7 + $0xf8] sm:$0xff] %v1171_v39  ;;  %v982_v43 = vadd.f32 %v981_v38, %v597_v40 }
 0x1a3   :  { %v601_v44 = vpop.f32.mrf.mxu0  ;;  %v986_v45 = vpop.f32.mrf.mxu1 }
 0x1a4   :  { %v1172_v46 = vmax.f32 %v982_v43, 0.0  ;;  %v602_v47 = vadd.f32 %v1466_v6, %v601_v44 }
 0x1a5   :  { %v603_v48 = vpop.f32.mrf.mxu0  ;;  %v988_v49 = vpop.f32.mrf.mxu1 }
 0x1a6   :  { %1236 = vst [vmem:[#allocation7 + $0x100] sm:$0xff] %v1172_v46  ;;  %v987_v50 = vadd.f32 %v986_v45, %v602_v47 }
 0x1a7   :  { %v606_v51 = vpop.f32.mrf.mxu0  ;;  %v991_v52 = vpop.f32.mrf.mxu1 }
 0x1a8   :  { %v1173_v53 = vmax.f32 %v987_v50, 0.0  ;;  %v607_v54 = vadd.f32 %v1466_v6, %v606_v51 }
 0x1a9   :  { %v608_v55 = vpop.f32.mrf.mxu0  ;;  %v993_v56 = vpop.f32.mrf.mxu1 }
 0x1aa   :  { %1237 = vst [vmem:[#allocation7 + $0x108] sm:$0xff] %v1173_v53  ;;  %v992_v57 = vadd.f32 %v991_v52, %v607_v54 }
 0x1ab   :  { %v611_v58 = vpop.f32.mrf.mxu0  ;;  %v996_v59 = vpop.f32.mrf.mxu1 }
 0x1ac   :  { %v1174_v60 = vmax.f32 %v992_v57, 0.0  ;;  %v612_v61 = vadd.f32 %v1466_v6, %v611_v58 }
 0x1ad   :  { %v613_v62 = vpop.f32.mrf.mxu0  ;;  %v998_v63 = vpop.f32.mrf.mxu1 }
 0x1ae   :  { %1238 = vst [vmem:[#allocation7 + $0x110] sm:$0xff] %v1174_v60  ;;  %v997_v1 = vadd.f32 %v996_v59, %v612_v61 }
 0x1af   :  { %v616_v2 = vpop.f32.mrf.mxu0  ;;  %v1001_v3 = vpop.f32.mrf.mxu1 }
 0x1b0   :  { %v1175_v4 = vmax.f32 %v997_v1, 0.0  ;;  %v617_v5 = vadd.f32 %v1466_v6, %v616_v2 }
 0x1b1   :  { %v618_v7 = vpop.f32.mrf.mxu0  ;;  %v1003_v8 = vpop.f32.mrf.mxu1 }
 0x1b2   :  { %1239 = vst [vmem:[#allocation7 + $0x118] sm:$0xff] %v1175_v4  ;;  %v1002_v9 = vadd.f32 %v1001_v3, %v617_v5 }
 0x1b3   :  { %v621_v10 = vpop.f32.mrf.mxu0  ;;  %v1006_v11 = vpop.f32.mrf.mxu1 }
 0x1b4   :  { %v1176_v0 = vmax.f32 %v1002_v9, 0.0  ;;  %v622_v12 = vadd.f32 %v1466_v6, %v621_v10 }
 0x1b5   :  { %v623_v13 = vpop.f32.mrf.mxu0  ;;  %v1008_v14 = vpop.f32.mrf.mxu1 }
 0x1b6   :  { %1240 = vst [vmem:[#allocation7 + $0x120] sm:$0xff] %v1176_v0  ;;  %v1007_v15 = vadd.f32 %v1006_v11, %v622_v12 }
 0x1b7   :  { %v626_v16 = vpop.f32.mrf.mxu0  ;;  %v1011_v17 = vpop.f32.mrf.mxu1 }
 0x1b8   :  { %v1177_v18 = vmax.f32 %v1007_v15, 0.0  ;;  %v627_v19 = vadd.f32 %v1466_v6, %v626_v16 }
 0x1b9   :  { %v628_v20 = vpop.f32.mrf.mxu0  ;;  %v1013_v21 = vpop.f32.mrf.mxu1 }
 0x1ba   :  { %1241 = vst [vmem:[#allocation7 + $0x128] sm:$0xff] %v1177_v18  ;;  %v1012_v22 = vadd.f32 %v1011_v17, %v627_v19 }
 0x1bb   :  { %v631_v23 = vpop.f32.mrf.mxu0  ;;  %v1016_v24 = vpop.f32.mrf.mxu1 }
 0x1bc   :  { %v1178_v25 = vmax.f32 %v1012_v22, 0.0  ;;  %v632_v26 = vadd.f32 %v1466_v6, %v631_v23 }
 0x1bd   :  { %v633_v27 = vpop.f32.mrf.mxu0  ;;  %v1018_v28 = vpop.f32.mrf.mxu1 }
 0x1be   :  { %1242 = vst [vmem:[#allocation7 + $0x130] sm:$0xff] %v1178_v25  ;;  %v1017_v29 = vadd.f32 %v1016_v24, %v632_v26 }
 0x1bf   :  { %v636_v30 = vpop.f32.mrf.mxu0  ;;  %v1021_v31 = vpop.f32.mrf.mxu1 }
 0x1c0   :  { %v1179_v32 = vmax.f32 %v1017_v29, 0.0  ;;  %v637_v33 = vadd.f32 %v1466_v6, %v636_v30 }
 0x1c1   :  { %v638_v34 = vpop.f32.mrf.mxu0  ;;  %v1023_v35 = vpop.f32.mrf.mxu1 }
 0x1c2   :  { %1243 = vst [vmem:[#allocation7 + $0x138] sm:$0xff] %v1179_v32  ;;  %v1022_v36 = vadd.f32 %v1021_v31, %v637_v33  ;;  %v1520_v33 = vld [vmem:[%s1545_s2] ss:$0 sm:$0xff]  ;;  %s1369_s2 = smov [#allocation7]  }
 0x1c3   :  { %v641_v37 = vpop.f32.mrf.mxu0  ;;  %v1026_v38 = vpop.f32.mrf.mxu1  ;;  %s1273_s28 = sshll.u32 %s1369_s2, 4  ;;  %s1274_s28 = int_to_ptr.vmem [resolvable:$true] %s1273_s28 }
 0x1c4   :  { %v1180_v39 = vmax.f32 %v1022_v36, 0.0  ;;  %v642_v40 = vadd.f32 %v1466_v6, %v641_v37  ;;  %s1336_s29 = scalar_lea.vmem %s1274_s28, 8192  ;;  %p1341_p11 = scmp.lt.s32.totalorder %s1274_s28, %s1274_s28 }
 0x1c5   :  { %v643_v41 = vpop.f32.mrf.mxu0  ;;  %v1028_v42 = vpop.f32.mrf.mxu1  ;;  %p1337_p10 = scmp.ne.s32.totalorder %s1274_s28, %s1336_s29  ;;  %p1342_p12 = scmp.lt.s32.totalorder %s1336_s29, %s1336_s29 }
 0x1c6   :  { %1244 = vst [vmem:[#allocation7 + $0x140] sm:$0xff] %v1180_v39  ;;  %v1027_v43 = vadd.f32 %v1026_v38, %v642_v40 }
 0x1c7   :  { %v646_v44 = vpop.f32.mrf.mxu0  ;;  %v1031_v45 = vpop.f32.mrf.mxu1  ;;  %p1343_p13 = por %p1342_p12, %p1341_p11 }
 0x1c8   :  { %v1181_v46 = vmax.f32 %v1027_v43, 0.0  ;;  %v647_v47 = vadd.f32 %v1466_v6, %v646_v44 }
 0x1c9   :  { %v648_v48 = vpop.f32.mrf.mxu0  ;;  %v1033_v49 = vpop.f32.mrf.mxu1  ;;  %p1344_p0 = pnand %p1343_p13, %p1337_p10 }
 0x1ca   :  { %1245 = vst [vmem:[#allocation7 + $0x148] sm:$0xff] %v1181_v46  ;;  %v1032_v50 = vadd.f32 %v1031_v45, %v647_v47 }
 0x1cb   :  { %v651_v51 = vpop.f32.mrf.mxu0  ;;  %v1036_v52 = vpop.f32.mrf.mxu1 }
 0x1cc   :  { %v1182_v53 = vmax.f32 %v1032_v50, 0.0  ;;  %v652_v54 = vadd.f32 %v1466_v6, %v651_v51 }
 0x1cd   :  { %v653_v55 = vpop.f32.mrf.mxu0  ;;  %v1038_v56 = vpop.f32.mrf.mxu1 }
 0x1ce   :  { %1246 = vst [vmem:[#allocation7 + $0x150] sm:$0xff] %v1182_v53  ;;  %v1037_v57 = vadd.f32 %v1036_v52, %v652_v54 }
 0x1cf   :  { %v656_v58 = vpop.f32.mrf.mxu0  ;;  %v1041_v59 = vpop.f32.mrf.mxu1 }
 0x1d0   :  { %v1183_v60 = vmax.f32 %v1037_v57, 0.0  ;;  %v657_v61 = vadd.f32 %v1466_v6, %v656_v58 }
 0x1d1   :  { %v658_v62 = vpop.f32.mrf.mxu0  ;;  %v1043_v63 = vpop.f32.mrf.mxu1 }
 0x1d2   :  { %1247 = vst [vmem:[#allocation7 + $0x158] sm:$0xff] %v1183_v60  ;;  %v1042_v1 = vadd.f32 %v1041_v59, %v657_v61 }
 0x1d3   :  { %v661_v2 = vpop.f32.mrf.mxu0  ;;  %v1046_v3 = vpop.f32.mrf.mxu1 }
 0x1d4   :  { %v1184_v4 = vmax.f32 %v1042_v1, 0.0  ;;  %v662_v5 = vadd.f32 %v1466_v6, %v661_v2 }
 0x1d5   :  { %v663_v7 = vpop.f32.mrf.mxu0  ;;  %v1048_v8 = vpop.f32.mrf.mxu1 }
 0x1d6   :  { %1248 = vst [vmem:[#allocation7 + $0x160] sm:$0xff] %v1184_v4  ;;  %v1047_v9 = vadd.f32 %v1046_v3, %v662_v5 }
 0x1d7   :  { %v666_v10 = vpop.f32.mrf.mxu0  ;;  %v1051_v11 = vpop.f32.mrf.mxu1 }
 0x1d8   :  { %v1185_v0 = vmax.f32 %v1047_v9, 0.0  ;;  %v667_v12 = vadd.f32 %v1466_v6, %v666_v10 }
 0x1d9   :  { %v668_v13 = vpop.f32.mrf.mxu0  ;;  %v1053_v14 = vpop.f32.mrf.mxu1 }
 0x1da   :  { %1249 = vst [vmem:[#allocation7 + $0x168] sm:$0xff] %v1185_v0  ;;  %v1052_v15 = vadd.f32 %v1051_v11, %v667_v12 }
 0x1db   :  { %v671_v16 = vpop.f32.mrf.mxu0  ;;  %v1056_v17 = vpop.f32.mrf.mxu1 }
 0x1dc   :  { %v1186_v18 = vmax.f32 %v1052_v15, 0.0  ;;  %v672_v19 = vadd.f32 %v1466_v6, %v671_v16 }
 0x1dd   :  { %v673_v20 = vpop.f32.mrf.mxu0  ;;  %v1058_v21 = vpop.f32.mrf.mxu1 }
 0x1de   :  { %1250 = vst [vmem:[#allocation7 + $0x170] sm:$0xff] %v1186_v18  ;;  %v1057_v22 = vadd.f32 %v1056_v17, %v672_v19 }
 0x1df   :  { %v676_v23 = vpop.f32.mrf.mxu0  ;;  %v1061_v24 = vpop.f32.mrf.mxu1 }
 0x1e0   :  { %v1187_v25 = vmax.f32 %v1057_v22, 0.0  ;;  %v677_v26 = vadd.f32 %v1466_v6, %v676_v23 }
 0x1e1   :  { %v678_v27 = vpop.f32.mrf.mxu0  ;;  %v1063_v28 = vpop.f32.mrf.mxu1 }
 0x1e2   :  { %1251 = vst [vmem:[#allocation7 + $0x178] sm:$0xff] %v1187_v25  ;;  %v1062_v29 = vadd.f32 %v1061_v24, %v677_v26 }
 0x1e3   :  { %v681_v30 = vpop.f32.mrf.mxu0  ;;  %v1066_v31 = vpop.f32.mrf.mxu1 }
 0x1e4   :  { %v1188_v32 = vmax.f32 %v1062_v29, 0.0  ;;  %v682_v34 = vadd.f32 %v1520_v33, %v681_v30 }
 0x1e5   :  { %v683_v35 = vpop.f32.mrf.mxu0  ;;  %v1068_v36 = vpop.f32.mrf.mxu1 }
 0x1e6   :  { %1252 = vst [vmem:[#allocation7 + $0x180] sm:$0xff] %v1188_v32  ;;  %v1067_v37 = vadd.f32 %v1066_v31, %v682_v34 }
 0x1e7   :  { %v686_v38 = vpop.f32.mrf.mxu0  ;;  %v1071_v6 = vpop.f32.mrf.mxu1 }
 0x1e8   :  { %v1189_v39 = vmax.f32 %v1067_v37, 0.0  ;;  %v687_v40 = vadd.f32 %v1520_v33, %v686_v38 }
 0x1e9   :  { %v688_v41 = vpop.f32.mrf.mxu0  ;;  %v1073_v42 = vpop.f32.mrf.mxu1 }
 0x1ea   :  { %1253 = vst [vmem:[#allocation7 + $0x188] sm:$0xff] %v1189_v39  ;;  %v1072_v43 = vadd.f32 %v1071_v6, %v687_v40 }
 0x1eb   :  { %v691_v44 = vpop.f32.mrf.mxu0  ;;  %v1076_v45 = vpop.f32.mrf.mxu1 }
 0x1ec   :  { %v1190_v46 = vmax.f32 %v1072_v43, 0.0  ;;  %v692_v47 = vadd.f32 %v1520_v33, %v691_v44 }
 0x1ed   :  { %v693_v48 = vpop.f32.mrf.mxu0  ;;  %v1078_v49 = vpop.f32.mrf.mxu1 }
 0x1ee   :  { %1254 = vst [vmem:[#allocation7 + $0x190] sm:$0xff] %v1190_v46  ;;  %v1077_v50 = vadd.f32 %v1076_v45, %v692_v47 }
 0x1ef   :  { %v696_v51 = vpop.f32.mrf.mxu0  ;;  %v1081_v52 = vpop.f32.mrf.mxu1 }
 0x1f0   :  { %v1191_v53 = vmax.f32 %v1077_v50, 0.0  ;;  %v697_v54 = vadd.f32 %v1520_v33, %v696_v51 }
 0x1f1   :  { %v698_v55 = vpop.f32.mrf.mxu0  ;;  %v1083_v56 = vpop.f32.mrf.mxu1 }
 0x1f2   :  { %1255 = vst [vmem:[#allocation7 + $0x198] sm:$0xff] %v1191_v53  ;;  %v1082_v57 = vadd.f32 %v1081_v52, %v697_v54 }
 0x1f3   :  { %v701_v58 = vpop.f32.mrf.mxu0  ;;  %v1086_v59 = vpop.f32.mrf.mxu1 }
 0x1f4   :  { %v1192_v60 = vmax.f32 %v1082_v57, 0.0  ;;  %v702_v61 = vadd.f32 %v1520_v33, %v701_v58 }
 0x1f5   :  { %v703_v62 = vpop.f32.mrf.mxu0  ;;  %v1088_v63 = vpop.f32.mrf.mxu1 }
 0x1f6   :  { %1256 = vst [vmem:[#allocation7 + $0x1a0] sm:$0xff] %v1192_v60  ;;  %v1087_v1 = vadd.f32 %v1086_v59, %v702_v61 }
 0x1f7   :  { %v706_v2 = vpop.f32.mrf.mxu0  ;;  %v1091_v3 = vpop.f32.mrf.mxu1 }
 0x1f8   :  { %v1193_v4 = vmax.f32 %v1087_v1, 0.0  ;;  %v707_v5 = vadd.f32 %v1520_v33, %v706_v2 }
 0x1f9   :  { %v708_v7 = vpop.f32.mrf.mxu0  ;;  %v1093_v8 = vpop.f32.mrf.mxu1 }
 0x1fa   :  { %1257 = vst [vmem:[#allocation7 + $0x1a8] sm:$0xff] %v1193_v4  ;;  %v1092_v9 = vadd.f32 %v1091_v3, %v707_v5 }
 0x1fb   :  { %v711_v10 = vpop.f32.mrf.mxu0  ;;  %v1096_v11 = vpop.f32.mrf.mxu1 }
 0x1fc   :  { %v1194_v0 = vmax.f32 %v1092_v9, 0.0  ;;  %v712_v12 = vadd.f32 %v1520_v33, %v711_v10 }
 0x1fd   :  { %v713_v13 = vpop.f32.mrf.mxu0  ;;  %v1098_v14 = vpop.f32.mrf.mxu1 }
 0x1fe   :  { %1258 = vst [vmem:[#allocation7 + $0x1b0] sm:$0xff] %v1194_v0  ;;  %v1097_v15 = vadd.f32 %v1096_v11, %v712_v12 }
 0x1ff   :  { %v716_v16 = vpop.f32.mrf.mxu0  ;;  %v1101_v17 = vpop.f32.mrf.mxu1 }
 0x200   :  { %v1195_v18 = vmax.f32 %v1097_v15, 0.0  ;;  %v717_v19 = vadd.f32 %v1520_v33, %v716_v16 }
 0x201   :  { %v718_v20 = vpop.f32.mrf.mxu0  ;;  %v1103_v21 = vpop.f32.mrf.mxu1 }
 0x202   :  { %1259 = vst [vmem:[#allocation7 + $0x1b8] sm:$0xff] %v1195_v18  ;;  %v1102_v22 = vadd.f32 %v1101_v17, %v717_v19 }
 0x203   :  { %v721_v23 = vpop.f32.mrf.mxu0  ;;  %v1106_v24 = vpop.f32.mrf.mxu1 }
 0x204   :  { %v1196_v25 = vmax.f32 %v1102_v22, 0.0  ;;  %v722_v26 = vadd.f32 %v1520_v33, %v721_v23 }
 0x205   :  { %v723_v27 = vpop.f32.mrf.mxu0  ;;  %v1108_v28 = vpop.f32.mrf.mxu1 }
 0x206   :  { %1260 = vst [vmem:[#allocation7 + $0x1c0] sm:$0xff] %v1196_v25  ;;  %v1107_v29 = vadd.f32 %v1106_v24, %v722_v26 }
 0x207   :  { %v726_v30 = vpop.f32.mrf.mxu0  ;;  %v1111_v31 = vpop.f32.mrf.mxu1 }
 0x208   :  { %v1197_v32 = vmax.f32 %v1107_v29, 0.0  ;;  %v727_v34 = vadd.f32 %v1520_v33, %v726_v30 }
 0x209   :  { %v728_v35 = vpop.f32.mrf.mxu0  ;;  %v1113_v36 = vpop.f32.mrf.mxu1 }
 0x20a   :  { %1261 = vst [vmem:[#allocation7 + $0x1c8] sm:$0xff] %v1197_v32  ;;  %v1112_v37 = vadd.f32 %v1111_v31, %v727_v34 }
 0x20b   :  { %v731_v38 = vpop.f32.mrf.mxu0  ;;  %v1116_v6 = vpop.f32.mrf.mxu1 }
 0x20c   :  { %v1198_v39 = vmax.f32 %v1112_v37, 0.0  ;;  %v732_v40 = vadd.f32 %v1520_v33, %v731_v38 }
 0x20d   :  { %v733_v41 = vpop.f32.mrf.mxu0  ;;  %v1118_v42 = vpop.f32.mrf.mxu1 }
 0x20e   :  { %1262 = vst [vmem:[#allocation7 + $0x1d0] sm:$0xff] %v1198_v39  ;;  %v1117_v43 = vadd.f32 %v1116_v6, %v732_v40 }
 0x20f   :  { %v736_v44 = vpop.f32.mrf.mxu0  ;;  %v1121_v45 = vpop.f32.mrf.mxu1 }
 0x210   :  { %v1199_v46 = vmax.f32 %v1117_v43, 0.0  ;;  %v737_v47 = vadd.f32 %v1520_v33, %v736_v44 }
 0x211   :  { %v738_v48 = vpop.f32.mrf.mxu0  ;;  %v1123_v49 = vpop.f32.mrf.mxu1 }
 0x212   :  { %1263 = vst [vmem:[#allocation7 + $0x1d8] sm:$0xff] %v1199_v46  ;;  %v1122_v50 = vadd.f32 %v1121_v45, %v737_v47 }
 0x213   :  { %v741_v51 = vpop.f32.mrf.mxu0  ;;  %v1126_v52 = vpop.f32.mrf.mxu1 }
 0x214   :  { %v1200_v53 = vmax.f32 %v1122_v50, 0.0  ;;  %v742_v54 = vadd.f32 %v1520_v33, %v741_v51 }
 0x215   :  { %v743_v55 = vpop.f32.mrf.mxu0  ;;  %v1128_v56 = vpop.f32.mrf.mxu1 }
 0x216   :  { %1264 = vst [vmem:[#allocation7 + $0x1e0] sm:$0xff] %v1200_v53  ;;  %v1127_v57 = vadd.f32 %v1126_v52, %v742_v54 }
 0x217   :  { %v746_v58 = vpop.f32.mrf.mxu0  ;;  %v1131_v59 = vpop.f32.mrf.mxu1 }
 0x218   :  { %v1201_v60 = vmax.f32 %v1127_v57, 0.0  ;;  %v747_v61 = vadd.f32 %v1520_v33, %v746_v58 }
 0x219   :  { %v748_v62 = vpop.f32.mrf.mxu0  ;;  %v1133_v63 = vpop.f32.mrf.mxu1 }
 0x21a   :  { %1265 = vst [vmem:[#allocation7 + $0x1e8] sm:$0xff] %v1201_v60  ;;  %v1132_v1 = vadd.f32 %v1131_v59, %v747_v61 }
 0x21b   :  { %v751_v2 = vpop.f32.mrf.mxu0  ;;  %v1136_v3 = vpop.f32.mrf.mxu1 }
 0x21c   :  { %v1202_v4 = vmax.f32 %v1132_v1, 0.0  ;;  %v752_v5 = vadd.f32 %v1520_v33, %v751_v2 }
 0x21d   :  { %v753_v7 = vpop.f32.mrf.mxu0  ;;  %v1138_v8 = vpop.f32.mrf.mxu1 }
 0x21e   :  { %1266 = vst [vmem:[#allocation7 + $0x1f0] sm:$0xff] %v1202_v4  ;;  %v1137_v9 = vadd.f32 %v1136_v3, %v752_v5 }
 0x220   :  { %v1203_v10 = vmax.f32 %v1137_v9, 0.0 }
 0x222   :  { %1267 = vst [vmem:[#allocation7 + $0x1f8] sm:$0xff] %v1203_v10 }
 0x223   :  { %1347 = shalt.err (!%p1344_p0)
}
 0x224   :  { %1279 = dma.vmem_to_hbm [thread:$0]  %s1274_s28, 8192, %s1546_s3, [#allocation4], %s1366_s22, %s1366_s22, %s1367_s23  }
 0x225   :  { %1360 = dma.done.wait [#allocation4], 8192  }
 0x226   :  { %1361 = vsyncadd [#allocation4], 4294959104 }
 0x227   :  { %1283 = vsyncpa [#allocation3], 1 }
 0x228   :  { %1284 = vsyncpa [#allocation6], 1 }
 0x229   :  { %1285 = vsyncpa [#allocation4], 1 }

</bundles_post_ra>
